<compile_context>
chip_gen: v7x
topology: tpu7x:2x2x1
jax: 0.10.0
libtpu: 0.0.40
codegen_flags: <defaults>
</compile_context>

<pallas_src>
import numpy as np
import jax
import jax.numpy as jnp
from jax import lax
from jax.experimental import pallas as pl
from jax.experimental.pallas import tpu as pltpu


def _round_up(x, m):
    return (x + m - 1) // m * m


def complete_graph_edges(n):
    return [(s, d) for s in range(n) for d in range(n) if s != d]


# --------------------------------------------------------------------------- #
# Parameters (deterministic, PyTorch nn.Linear-style init; weights are [in, out])
# --------------------------------------------------------------------------- #
def init_params(key, dim_in_node, mid_pair, mid_nodes, num_acts):
    def linear(key, fan_in, fan_out):
        kw, kb = jax.random.split(key)
        bound = 1.0 / np.sqrt(fan_in)
        w = jax.random.uniform(kw, (fan_in, fan_out), jnp.float32, -bound, bound)
        b = jax.random.uniform(kb, (1, fan_out), jnp.float32, -bound, bound)
        return w, b

    ks = jax.random.split(key, 6)
    p = {}
    p['ju1_w'], p['ju1_b'] = linear(ks[0], 3 * dim_in_node, mid_pair)
    p['ju3_w'], p['ju3_b'] = linear(ks[1], mid_pair, mid_pair)
    p['ju2_w'], p['ju2_b'] = linear(ks[2], mid_pair, num_acts * num_acts)  # pair_comp='avg'
    p['iu1_w'], p['iu1_b'] = linear(ks[3], 2 * dim_in_node, mid_nodes)
    p['iu3_w'], p['iu3_b'] = linear(ks[4], mid_nodes, mid_nodes)
    p['iu2_w'], p['iu2_b'] = linear(ks[5], mid_nodes, num_acts)
    return p


# --------------------------------------------------------------------------- #
# Builder: packs weights + static graph matrices (NumPy, outside jit) into one
# slab and returns a jit-able batched forward wrapping a single pallas_call.
# --------------------------------------------------------------------------- #
def build_util_layer(params, *, dim_in_node, mid_pair, mid_nodes, num_acts,
                     num_nodes, b_tile):
    A = num_acts
    N = num_nodes
    DN, DE = 2 * dim_in_node, 3 * dim_in_node
    MN, MP = mid_nodes, mid_pair

    edges = complete_graph_edges(N)
    E = len(edges)
    src = np.asarray([s for s, _ in edges], np.int32)
    dst = np.asarray([d for _, d in edges], np.int32)

    NPAD, EPAD = _round_up(N, 8), _round_up(E, 8)     # per-graph sublane-aligned rows
    NN, NE = b_tile * NPAD, b_tile * EPAD             # per-grid-step node / edge rows
    R = NN + 2 * NE                                   # stacked [nodes ; edge_u ; edge_r]
    K1P = _round_up(DN + 2 * DE + 1, 8)               # layer-1 input  (+ ones carrier)
    K2P = _round_up(MN + 2 * MP + 1, 8)               # hidden width   (+ ones carrier)
    NOUTP = _round_up(A * A + A, 8)                   # [edge out A*A | node out A]
    OUT_W = 3 * 128                                   # pred | target | q lane groups

    p = {k: np.asarray(v, np.float32) for k, v in params.items()}
    perm = np.arange(A * A).reshape(A, A).T.reshape(-1)   # flat (i,j) -> (j,i)

    # ---- block-diagonal fused MLP weights; biases folded into the ones-carrier row
    W1 = np.zeros((K1P, K2P), np.float32)
    W1[0:DN, 0:MN] = p['iu1_w']
    W1[DN:DN + DE, MN:MN + MP] = p['ju1_w']
    W1[DN + DE:DN + 2 * DE, MN + MP:MN + 2 * MP] = p['ju1_w']
    W1[K1P - 1, 0:MN] = p['iu1_b'][0]
    W1[K1P - 1, MN:MN + MP] = p['ju1_b'][0]
    W1[K1P - 1, MN + MP:MN + 2 * MP] = p['ju1_b'][0]
    W1[K1P - 1, K2P - 1] = 1.0                        # keep ones carrier alive

    W2 = np.zeros((K2P, K2P), np.float32)
    W2[0:MN, 0:MN] = p['iu3_w']
    W2[MN:MN + MP, MN:MN + MP] = p['ju3_w']
    W2[MN + MP:MN + 2 * MP, MN + MP:MN + 2 * MP] = p['ju3_w']
    W2[K2P - 1, 0:MN] = p['iu3_b'][0]
    W2[K2P - 1, MN:MN + MP] = p['ju3_b'][0]
    W2[K2P - 1, MN + MP:MN + 2 * MP] = p['ju3_b'][0]
    W2[K2P - 1, K2P - 1] = 1.0

    # 0.25 fold into ju2 blocks; each edge row carries HALF the combined bias so the
    # u+r pair sum restores the full 0.25*(ju2_b[perm] + ju2_b).
    W3 = np.zeros((K2P, NOUTP), np.float32)
    W3[0:MN, A * A:A * A + A] = p['iu2_w']
    W3[MN:MN + MP, 0:A * A] = 0.25 * p['ju2_w'][:, perm]        # 'u' branch, pre-transposed
    W3[MN + MP:MN + 2 * MP, 0:A * A] = 0.25 * p['ju2_w']        # reflected branch
    W3[K2P - 1, A * A:A * A + A] = p['iu2_b'][0]
    W3[K2P - 1, 0:A * A] = 0.125 * (p['ju2_b'][0, perm] + p['ju2_b'][0])

    # ---- static graph matrices (complete graph; zero index = node 0 of each graph)
    AG = np.repeat(np.eye(A, dtype=np.float32), A, axis=0)              # [A*A, A]
    ds1 = np.zeros((NPAD, EPAD), np.float32)
    ds1[dst, np.arange(E)] = 1.0                                        # dst segment-sum
    adj = np.zeros((NPAD, NPAD), np.float32)
    np.add.at(adj, (dst, src), 1.0)
    w0 = np.zeros((NPAD,), np.float32)
    w0[0] = 1.0
    rg1 = (adj + np.eye(NPAD, dtype=np.float32)) * w0[None, :]          # target regression
    eye_b = np.eye(b_tile, dtype=np.float32)
    DS = np.kron(eye_b, ds1)                                            # [NN, NE]
    RG = np.kron(eye_b, rg1)                                            # [NN, NN]
    GM = np.kron(eye_b, np.ones((NPAD, NPAD), np.float32))              # per-graph q pool

    # ---- pack everything into ONE resident VMEM slab (single DMA, 8-aligned offsets)
    sections = [W1, W2, W3, AG, DS, RG, GM]
    SLAB_W = _round_up(max(s.shape[1] for s in sections), 128)
    offs, rows = [], 0
    for s in sections:
        offs.append(rows)
        rows += _round_up(s.shape[0], 8)
    SLAB_R = _round_up(rows, 8)
    slab_np = np.zeros((SLAB_R, SLAB_W), np.float32)
    for off, s in zip(offs, sections):
        slab_np[off:off + s.shape[0], :s.shape[1]] = s
    O_W1, O_W2, O_W3, O_AG, O_DS, O_RG, O_GM = offs
    slab = jnp.asarray(slab_np)

    pow2A = (A & (A - 1)) == 0

    # ----------------------------------------------------------------------- #
    def kernel(slab_ref, nodes_ref, eu_ref, er_ref, actn_ref, acte_ref, out_ref):
        f32 = jnp.float32
        relu = lambda v: jnp.maximum(v, 0.0)
        sl = lambda o, r, c: slab_ref[pl.ds(o, r), pl.ds(0, c)]

        w1 = sl(O_W1, K1P, K2P)
        w2 = sl(O_W2, K2P, K2P)
        w3 = sl(O_W3, K2P, NOUTP)
        ag = sl(O_AG, A * A, A)
        ds_m = sl(O_DS, NN, NE)
        rg_m = sl(O_RG, NN, NN)
        gm_m = sl(O_GM, NN, NN)

        # -- assemble block-structured input rows [nodes ; edge_u ; edge_r]
        zn = lambda c: jnp.zeros((NN, c), f32)
        ze = lambda c: jnp.zeros((NE, c), f32)
        xn = jnp.concatenate([nodes_ref[...], zn(K1P - DN)], axis=1)
        xu = jnp.concatenate([ze(DN), eu_ref[...], ze(K1P - DN - DE)], axis=1)
        xr = jnp.concatenate([ze(DN + DE), er_ref[...], ze(K1P - DN - 2 * DE)], axis=1)
        x = jnp.concatenate([xn, xu, xr], axis=0)                       # [R, K1P]
        ones_col = (lax.broadcasted_iota(jnp.int32, (R, K1P), 1) == K1P - 1).astype(f32)
        x = x + ones_col                                                # bias carrier

        # -- fused block-diagonal MLP (biases live in the carrier row of each W)
        h1 = relu(jnp.dot(x, w1, preferred_element_type=f32))           # [R, K2P]
        h2 = relu(jnp.dot(h1, w2, preferred_element_type=f32))          # [R, K2P]

        # -- zero cross-branch bias garbage exactly before the head matmul
        row = lax.broadcasted_iota(jnp.int32, (R, K2P), 0)
        col = lax.broadcasted_iota(jnp.int32, (R, K2P), 1)
        keep = (col == K2P - 1)
        keep = keep | ((row < NN) & (col < MN))
        keep = keep | ((row >= NN) & (row < NN + NE) & (col >= MN) & (col < MN + MP))
        keep = keep | ((row >= NN + NE) & (col >= MN + MP) & (col < MN + 2 * MP))
        h2 = jnp.where(keep, h2, 0.0)

        y = jnp.dot(h2, w3, preferred_element_type=f32)                 # [R, NOUTP]

        indiv = jnp.abs(y[0:NN, A * A:A * A + A])                       # [NN, A]
        util_flat = jnp.abs(y[NN:NN + NE, 0:A * A] +                    # |uc^T + ucr| (0.25-scaled)
                            y[NN + NE:R, 0:A * A])                      # [NE, A*A]

        # -- one-hots from int32 action codes (iota compare; padded rows are -1 -> 0)
        acts_n = actn_ref[...]                                          # [NN, 1] int32
        acts_e = acte_ref[...]                                          # [NE, 1] int32
        oh = (lax.broadcasted_iota(jnp.int32, (NN, A), 1) == acts_n).astype(f32)
        cidx = lax.broadcasted_iota(jnp.int32, (NE, A * A), 1)
        colj = (cidx & (A - 1)) if pow2A else (cidx % A)
        sel = (colj == acts_e).astype(f32)                              # [NE, A*A]

        # -- gather util[:, :, acts[src]] and segment-sum into destination nodes
        u_msg = jnp.dot(util_flat * sel, ag, preferred_element_type=f32)    # [NE, A]
        u_msg_sum = jnp.dot(ds_m, u_msg, preferred_element_type=f32)        # [NN, A]

        # -- q / pred / target reductions
        g_mat = oh * indiv                                               # [NN, A]
        v_mat = oh * (indiv + u_msg_sum)                                 # indiv + 0.5*msg
        pred = jnp.sum(g_mat, axis=-1, keepdims=True)                    # [NN, 1]
        target = jnp.sum(jnp.dot(rg_m, g_mat, preferred_element_type=f32),
                         axis=-1, keepdims=True)                         # [NN, 1]
        q_all = jnp.sum(jnp.dot(gm_m, v_mat, preferred_element_type=f32),
                        axis=-1, keepdims=True)                          # per-graph q

        # -- single lane-dense output (unmasked full-vreg 128-wide stores)
        out_ref[:, pl.ds(0, 128)] = jnp.broadcast_to(pred, (NN, 128))
        out_ref[:, pl.ds(128, 128)] = jnp.broadcast_to(target, (NN, 128))
        out_ref[:, pl.ds(256, 128)] = jnp.broadcast_to(q_all, (NN, 128))

    # ----------------------------------------------------------------------- #
    def forward(node_feats_u, edge_feats_u, edge_feat_reflected_u, joint_acts):
        f32 = jnp.float32
        B = node_feats_u.shape[0]
        assert B % b_tile == 0, "batch must be a multiple of b_tile"
        G = B // b_tile

        nodes = jnp.pad(node_feats_u.astype(f32),
                        ((0, 0), (0, NPAD - N), (0, 0))).reshape(B * NPAD, DN)
        eu = jnp.pad(edge_feats_u.astype(f32),
                     ((0, 0), (0, EPAD - E), (0, 0))).reshape(B * EPAD, DE)
        er = jnp.pad(edge_feat_reflected_u.astype(f32),
                     ((0, 0), (0, EPAD - E), (0, 0))).reshape(B * EPAD, DE)
        actn = jnp.pad(joint_acts.astype(jnp.int32), ((0, 0), (0, NPAD - N)),
                       constant_values=-1).reshape(B * NPAD, 1)
        acts_src = joint_acts.astype(jnp.int32)[:, src]          # gather by static src
        acte = jnp.pad(acts_src, ((0, 0), (0, EPAD - E)),
                       constant_values=-1).reshape(B * EPAD, 1)

        out = pl.pallas_call(
            kernel,
            out_shape=jax.ShapeDtypeStruct((B * NPAD, OUT_W), f32),
            grid_spec=pltpu.PrefetchScalarGridSpec(
                num_scalar_prefetch=0,
                grid=(G,),
                in_specs=[
                    pl.BlockSpec((SLAB_R, SLAB_W), lambda g: (0, 0)),   # resident slab
                    pl.BlockSpec((NN, DN), lambda g: (g, 0)),
                    pl.BlockSpec((NE, DE), lambda g: (g, 0)),
                    pl.BlockSpec((NE, DE), lambda g: (g, 0)),
                    pl.BlockSpec((NN, 1), lambda g: (g, 0)),
                    pl.BlockSpec((NE, 1), lambda g: (g, 0)),
                ],
                out_specs=pl.BlockSpec((NN, OUT_W), lambda g: (g, 0)),
            ),
            compiler_params=pltpu.CompilerParams(
                dimension_semantics=("parallel",)),
        )(slab, nodes, eu, er, actn, acte)

        out = out.reshape(B, NPAD, OUT_W)
        pred_reg_values = out[:, :N, 0:1]
        target_reg_values = out[:, :N, 128:129]
        q_values = out[:, 0, 256:257]
        return q_values, pred_reg_values, target_reg_values

    return forward


# --------------------------------------------------------------------------- #
# Pure-JAX single-graph reference (mirrors the PyTorch ops 1:1)
# --------------------------------------------------------------------------- #
def reference_forward(params, src, dst, ef, nf, efr, joint_acts, num_acts):
    relu = lambda v: jnp.maximum(v, 0.0)
    N, E, A = nf.shape[0], ef.shape[0], num_acts
    indiv = jnp.abs(relu(relu(nf @ params['iu1_w'] + params['iu1_b'])
                         @ params['iu3_w'] + params['iu3_b'])
                    @ params['iu2_w'] + params['iu2_b'])
    uc = (relu(relu(ef @ params['ju1_w'] + params['ju1_b'])
               @ params['ju3_w'] + params['ju3_b'])
          @ params['ju2_w'] + params['ju2_b']).reshape(E, A, A)
    ucr = (relu(relu(efr @ params['ju1_w'] + params['ju1_b'])
                @ params['ju3_w'] + params['ju3_b'])
           @ params['ju2_w'] + params['ju2_b']).reshape(E, A, A).transpose(0, 2, 1)
    util_vals = jnp.abs(((uc + ucr) / 2.0).transpose(0, 2, 1))
    acts_src = joint_acts[src]
    u_msg = jnp.take_along_axis(
        util_vals, jnp.broadcast_to(acts_src[:, None, None], (E, A, 1)), axis=-1).squeeze(-1)
    u_msg_sum = jax.ops.segment_sum(u_msg, dst, num_segments=N)
    gathered = jnp.take_along_axis(indiv + 0.5 * u_msg_sum, joint_acts[:, None], axis=-1)
    q = jnp.sum(gathered, axis=0, keepdims=True)
    pred = jnp.take_along_axis(indiv, joint_acts[:, None], axis=-1)
    weights = jnp.zeros((N, 1), jnp.float32).at[0, 0].set(1.0)
    target_indiv = pred * weights
    target = jax.ops.segment_sum(target_indiv[src], dst, num_segments=N) + target_indiv
    return q, pred, target


# --------------------------------------------------------------------------- #
if __name__ == "__main__":
    D = 8            # dim_in_node
    MID_PAIR = 32
    MID_NODES = 32
    A = 8            # num_acts
    N = 4            # nodes per complete graph
    B = 8            # batch of independent graphs (dgl-batched equivalent)
    B_TILE = 4       # graphs per grid step -> grid=(2,)

    edges = complete_graph_edges(N)
    E = len(edges)
    src_np = np.asarray([s for s, _ in edges], np.int32)
    dst_np = np.asarray([d for _, d in edges], np.int32)
    rev = np.asarray([edges.index((d, s)) for s, d in edges], np.int32)

    key = jax.random.PRNGKey(0)
    kp, kn, ke, ka = jax.random.split(key, 4)
    params = init_params(kp, D, MID_PAIR, MID_NODES, A)

    node_feats = jax.random.normal(kn, (B, N, 2 * D), jnp.float32)
    edge_feats = jax.random.normal(ke, (B, E, 3 * D), jnp.float32)
    edge_feats_r = edge_feats[:, rev, :]                       # reverse-edge features
    joint_acts = jax.random.randint(ka, (B, N), 0, A, dtype=jnp.int32)

    forward = build_util_layer(params, dim_in_node=D, mid_pair=MID_PAIR,
                               mid_nodes=MID_NODES, num_acts=A,
                               num_nodes=N, b_tile=B_TILE)
    fwd = jax.jit(forward)
    q, pred, target = fwd(node_feats, edge_feats, edge_feats_r, joint_acts)
    jax.block_until_ready((q, pred, target))

    # -- per-graph pure-JAX reference
    src_j, dst_j = jnp.asarray(src_np), jnp.asarray(dst_np)
    ref = jax.vmap(lambda ef, nf, efr, ja: reference_forward(
        params, src_j, dst_j, ef, nf, efr, ja, A))
    q_r, pred_r, target_r = ref(edge_feats, node_feats, edge_feats_r, joint_acts)

    # Tolerance covers MXU default-precision matmuls (incl. folded-bias rows) vs f32 ref.
    assert np.allclose(np.asarray(q), np.asarray(q_r).reshape(B, 1), rtol=2e-3, atol=2e-3)
    assert np.allclose(np.asarray(pred), np.asarray(pred_r), rtol=2e-3, atol=2e-3)
    assert np.allclose(np.asarray(target), np.asarray(target_r), rtol=2e-3, atol=2e-3)

    print("KERNEL_OK")
</pallas_src>

<mosaic_0001>
module attributes {stable_mosaic.version = 11 : i64} {
  func.func @kernel(%arg0: i32, %arg1: memref<440x128xf32, #tpu.memory_space<vmem>>, %arg2: memref<32x16xf32, #tpu.memory_space<vmem>>, %arg3: memref<64x24xf32, #tpu.memory_space<vmem>>, %arg4: memref<64x24xf32, #tpu.memory_space<vmem>>, %arg5: memref<32x1xi32, #tpu.memory_space<vmem>>, %arg6: memref<64x1xi32, #tpu.memory_space<vmem>>, %arg7: memref<32x384xf32, #tpu.memory_space<vmem>>) attributes {dimension_semantics = [#tpu.dimension_semantics<parallel>], iteration_bounds = array<i64: 2>, scalar_prefetch = 0 : i64, scratch_operands = 0 : i64, tpu.core_type = #tpu.core_type<tc>, window_params = [{pipeline_mode = #tpu.pipeline_mode<synchronous>, transform_indices = @transform_0, window_bounds = array<i64: 440, 128>}, {transform_indices = @transform_1, window_bounds = array<i64: 32, 16>}, {transform_indices = @transform_2, window_bounds = array<i64: 64, 24>}, {transform_indices = @transform_3, window_bounds = array<i64: 64, 24>}, {transform_indices = @transform_4, window_bounds = array<i64: 32, 1>}, {transform_indices = @transform_5, window_bounds = array<i64: 64, 1>}, {transform_indices = @transform_6, window_bounds = array<i64: 32, 384>}]} {
    %c0 = arith.constant 0 : index
    %c0_0 = arith.constant 0 : index
    %0 = vector.load %arg1[%c0, %c0_0] : memref<440x128xf32, #tpu.memory_space<vmem>>, vector<72x104xf32>
    %c72 = arith.constant 72 : index
    %c0_1 = arith.constant 0 : index
    %1 = vector.load %arg1[%c72, %c0_1] : memref<440x128xf32, #tpu.memory_space<vmem>>, vector<104x104xf32>
    %c176 = arith.constant 176 : index
    %c0_2 = arith.constant 0 : index
    %2 = vector.load %arg1[%c176, %c0_2] : memref<440x128xf32, #tpu.memory_space<vmem>>, vector<104x72xf32>
    %c280 = arith.constant 280 : index
    %c0_3 = arith.constant 0 : index
    %3 = vector.load %arg1[%c280, %c0_3] : memref<440x128xf32, #tpu.memory_space<vmem>>, vector<64x8xf32>
    %c344 = arith.constant 344 : index
    %c0_4 = arith.constant 0 : index
    %4 = vector.load %arg1[%c344, %c0_4] : memref<440x128xf32, #tpu.memory_space<vmem>>, vector<32x64xf32>
    %c376 = arith.constant 376 : index
    %c0_5 = arith.constant 0 : index
    %5 = vector.load %arg1[%c376, %c0_5] : memref<440x128xf32, #tpu.memory_space<vmem>>, vector<32x32xf32>
    %c408 = arith.constant 408 : index
    %c0_6 = arith.constant 0 : index
    %6 = vector.load %arg1[%c408, %c0_6] : memref<440x128xf32, #tpu.memory_space<vmem>>, vector<32x32xf32>
    %c0_7 = arith.constant 0 : index
    %c0_8 = arith.constant 0 : index
    %7 = vector.load %arg2[%c0_7, %c0_8] : memref<32x16xf32, #tpu.memory_space<vmem>>, vector<32x16xf32>
    %cst = arith.constant 0.000000e+00 : f32
    %8 = vector.broadcast %cst : f32 to vector<32x56xf32>
    %9 = tpu.concatenate %7, %8 in 1 : vector<32x16xf32>, vector<32x56xf32> -> vector<32x72xf32>
    %cst_9 = arith.constant 0.000000e+00 : f32
    %10 = vector.broadcast %cst_9 : f32 to vector<64x16xf32>
    %c0_10 = arith.constant 0 : index
    %c0_11 = arith.constant 0 : index
    %11 = vector.load %arg3[%c0_10, %c0_11] : memref<64x24xf32, #tpu.memory_space<vmem>>, vector<64x24xf32>
    %cst_12 = arith.constant 0.000000e+00 : f32
    %12 = vector.broadcast %cst_12 : f32 to vector<64x32xf32>
    %13 = tpu.concatenate %10, %11, %12 in 1 : vector<64x16xf32>, vector<64x24xf32>, vector<64x32xf32> -> vector<64x72xf32>
    %cst_13 = arith.constant 0.000000e+00 : f32
    %14 = vector.broadcast %cst_13 : f32 to vector<64x40xf32>
    %c0_14 = arith.constant 0 : index
    %c0_15 = arith.constant 0 : index
    %15 = vector.load %arg4[%c0_14, %c0_15] : memref<64x24xf32, #tpu.memory_space<vmem>>, vector<64x24xf32>
    %cst_16 = arith.constant 0.000000e+00 : f32
    %16 = vector.broadcast %cst_16 : f32 to vector<64x8xf32>
    %17 = tpu.concatenate %14, %15, %16 in 1 : vector<64x40xf32>, vector<64x24xf32>, vector<64x8xf32> -> vector<64x72xf32>
    %18 = tpu.concatenate %9, %13, %17 in 0 : vector<32x72xf32>, vector<64x72xf32>, vector<64x72xf32> -> vector<160x72xf32>
    %19 = tpu.iota {dimensions = array<i32: 1>} : vector<160x72xi32>
    %c71_i32 = arith.constant 71 : i32
    %20 = vector.broadcast %c71_i32 : i32 to vector<160x72xi32>
    %21 = arith.cmpi eq, %19, %20 : vector<160x72xi32>
    %22 = arith.extui %21 : vector<160x72xi1> to vector<160x72xi32>
    %23 = arith.sitofp %22 : vector<160x72xi32> to vector<160x72xf32>
    %24 = arith.addf %18, %23 : vector<160x72xf32>
    %cst_17 = arith.constant dense<0.000000e+00> : vector<160x104xf32>
    %25 = tpu.matmul %24, %0, %cst_17 {dimension_numbers = #tpu.dot_dimension_numbers<[1], [0], [0], [1], [0, 0, 1, 1], [], []>} : vector<160x72xf32>, vector<72x104xf32>, vector<160x104xf32> -> vector<160x104xf32>
    %cst_18 = arith.constant 0.000000e+00 : f32
    %26 = vector.broadcast %cst_18 : f32 to vector<160x104xf32>
    %27 = arith.maximumf %25, %26 : vector<160x104xf32>
    %cst_19 = arith.constant dense<0.000000e+00> : vector<160x104xf32>
    %28 = tpu.matmul %27, %1, %cst_19 {dimension_numbers = #tpu.dot_dimension_numbers<[1], [0], [0], [1], [0, 0, 1, 1], [], []>} : vector<160x104xf32>, vector<104x104xf32>, vector<160x104xf32> -> vector<160x104xf32>
    %cst_20 = arith.constant 0.000000e+00 : f32
    %29 = vector.broadcast %cst_20 : f32 to vector<160x104xf32>
    %30 = arith.maximumf %28, %29 : vector<160x104xf32>
    %31 = tpu.iota {dimensions = array<i32: 0>} : vector<160x104xi32>
    %32 = tpu.iota {dimensions = array<i32: 1>} : vector<160x104xi32>
    %c103_i32 = arith.constant 103 : i32
    %33 = vector.broadcast %c103_i32 : i32 to vector<160x104xi32>
    %34 = arith.cmpi eq, %32, %33 : vector<160x104xi32>
    %c32_i32 = arith.constant 32 : i32
    %35 = vector.broadcast %c32_i32 : i32 to vector<160x104xi32>
    %36 = arith.cmpi slt, %31, %35 : vector<160x104xi32>
    %c32_i32_21 = arith.constant 32 : i32
    %37 = vector.broadcast %c32_i32_21 : i32 to vector<160x104xi32>
    %38 = arith.cmpi slt, %32, %37 : vector<160x104xi32>
    %39 = arith.andi %36, %38 : vector<160x104xi1>
    %40 = arith.ori %34, %39 : vector<160x104xi1>
    %c32_i32_22 = arith.constant 32 : i32
    %41 = vector.broadcast %c32_i32_22 : i32 to vector<160x104xi32>
    %42 = arith.cmpi sge, %31, %41 : vector<160x104xi32>
    %c96_i32 = arith.constant 96 : i32
    %43 = vector.broadcast %c96_i32 : i32 to vector<160x104xi32>
    %44 = arith.cmpi slt, %31, %43 : vector<160x104xi32>
    %45 = arith.andi %42, %44 : vector<160x104xi1>
    %c32_i32_23 = arith.constant 32 : i32
    %46 = vector.broadcast %c32_i32_23 : i32 to vector<160x104xi32>
    %47 = arith.cmpi sge, %32, %46 : vector<160x104xi32>
    %48 = arith.andi %45, %47 : vector<160x104xi1>
    %c64_i32 = arith.constant 64 : i32
    %49 = vector.broadcast %c64_i32 : i32 to vector<160x104xi32>
    %50 = arith.cmpi slt, %32, %49 : vector<160x104xi32>
    %51 = arith.andi %48, %50 : vector<160x104xi1>
    %52 = arith.ori %40, %51 : vector<160x104xi1>
    %c96_i32_24 = arith.constant 96 : i32
    %53 = vector.broadcast %c96_i32_24 : i32 to vector<160x104xi32>
    %54 = arith.cmpi sge, %31, %53 : vector<160x104xi32>
    %c64_i32_25 = arith.constant 64 : i32
    %55 = vector.broadcast %c64_i32_25 : i32 to vector<160x104xi32>
    %56 = arith.cmpi sge, %32, %55 : vector<160x104xi32>
    %57 = arith.andi %54, %56 : vector<160x104xi1>
    %c96_i32_26 = arith.constant 96 : i32
    %58 = vector.broadcast %c96_i32_26 : i32 to vector<160x104xi32>
    %59 = arith.cmpi slt, %32, %58 : vector<160x104xi32>
    %60 = arith.andi %57, %59 : vector<160x104xi1>
    %61 = arith.ori %52, %60 : vector<160x104xi1>
    %cst_27 = arith.constant 0.000000e+00 : f32
    %62 = vector.broadcast %cst_27 : f32 to vector<160x104xf32>
    %63 = arith.select %61, %30, %62 : vector<160x104xi1>, vector<160x104xf32>
    %cst_28 = arith.constant dense<0.000000e+00> : vector<160x72xf32>
    %64 = tpu.matmul %63, %2, %cst_28 {dimension_numbers = #tpu.dot_dimension_numbers<[1], [0], [0], [1], [0, 0, 1, 1], [], []>} : vector<160x104xf32>, vector<104x72xf32>, vector<160x72xf32> -> vector<160x72xf32>
    %65 = vector.extract_strided_slice %64 {offsets = [0, 64], sizes = [32, 8], strides = [1, 1]} : vector<160x72xf32> to vector<32x8xf32>
    %66 = math.absf %65 : vector<32x8xf32>
    %67 = vector.extract_strided_slice %64 {offsets = [32, 0], sizes = [64, 64], strides = [1, 1]} : vector<160x72xf32> to vector<64x64xf32>
    %68 = vector.extract_strided_slice %64 {offsets = [96, 0], sizes = [64, 64], strides = [1, 1]} : vector<160x72xf32> to vector<64x64xf32>
    %69 = arith.addf %67, %68 : vector<64x64xf32>
    %70 = math.absf %69 : vector<64x64xf32>
    %c0_29 = arith.constant 0 : index
    %c0_30 = arith.constant 0 : index
    %71 = vector.load %arg5[%c0_29, %c0_30] : memref<32x1xi32, #tpu.memory_space<vmem>>, vector<32x1xi32>
    %c0_31 = arith.constant 0 : index
    %c0_32 = arith.constant 0 : index
    %72 = vector.load %arg6[%c0_31, %c0_32] : memref<64x1xi32, #tpu.memory_space<vmem>>, vector<64x1xi32>
    %73 = tpu.iota {dimensions = array<i32: 1>} : vector<32x8xi32>
    %74 = vector.broadcast %71 : vector<32x1xi32> to vector<32x8xi32>
    %75 = arith.cmpi eq, %73, %74 : vector<32x8xi32>
    %76 = arith.extui %75 : vector<32x8xi1> to vector<32x8xi32>
    %77 = arith.sitofp %76 : vector<32x8xi32> to vector<32x8xf32>
    %78 = tpu.iota {dimensions = array<i32: 1>} : vector<64x64xi32>
    %c7_i32 = arith.constant 7 : i32
    %79 = vector.broadcast %c7_i32 : i32 to vector<64x64xi32>
    %80 = arith.andi %78, %79 : vector<64x64xi32>
    %81 = vector.broadcast %72 : vector<64x1xi32> to vector<64x64xi32>
    %82 = arith.cmpi eq, %80, %81 : vector<64x64xi32>
    %83 = arith.extui %82 : vector<64x64xi1> to vector<64x64xi32>
    %84 = arith.sitofp %83 : vector<64x64xi32> to vector<64x64xf32>
    %85 = arith.mulf %70, %84 : vector<64x64xf32>
    %cst_33 = arith.constant dense<0.000000e+00> : vector<64x8xf32>
    %86 = tpu.matmul %85, %3, %cst_33 {dimension_numbers = #tpu.dot_dimension_numbers<[1], [0], [0], [1], [0, 0, 1, 1], [], []>} : vector<64x64xf32>, vector<64x8xf32>, vector<64x8xf32> -> vector<64x8xf32>
    %cst_34 = arith.constant dense<0.000000e+00> : vector<32x8xf32>
    %87 = tpu.matmul %4, %86, %cst_34 {dimension_numbers = #tpu.dot_dimension_numbers<[1], [0], [0], [1], [0, 0, 1, 1], [], []>} : vector<32x64xf32>, vector<64x8xf32>, vector<32x8xf32> -> vector<32x8xf32>
    %88 = arith.mulf %77, %66 : vector<32x8xf32>
    %89 = arith.addf %66, %87 : vector<32x8xf32>
    %90 = arith.mulf %77, %89 : vector<32x8xf32>
    %cst_35 = arith.constant dense<0.000000e+00> : vector<32xf32>
    %91 = vector.multi_reduction <add>, %88, %cst_35 [1] : vector<32x8xf32> to vector<32xf32>
    %92 = vector.shape_cast %91 : vector<32xf32> to vector<32x1xf32>
    %cst_36 = arith.constant dense<0.000000e+00> : vector<32x8xf32>
    %93 = tpu.matmul %5, %88, %cst_36 {dimension_numbers = #tpu.dot_dimension_numbers<[1], [0], [0], [1], [0, 0, 1, 1], [], []>} : vector<32x32xf32>, vector<32x8xf32>, vector<32x8xf32> -> vector<32x8xf32>
    %cst_37 = arith.constant dense<0.000000e+00> : vector<32xf32>
    %94 = vector.multi_reduction <add>, %93, %cst_37 [1] : vector<32x8xf32> to vector<32xf32>
    %95 = vector.shape_cast %94 : vector<32xf32> to vector<32x1xf32>
    %cst_38 = arith.constant dense<0.000000e+00> : vector<32x8xf32>
    %96 = tpu.matmul %6, %90, %cst_38 {dimension_numbers = #tpu.dot_dimension_numbers<[1], [0], [0], [1], [0, 0, 1, 1], [], []>} : vector<32x32xf32>, vector<32x8xf32>, vector<32x8xf32> -> vector<32x8xf32>
    %cst_39 = arith.constant dense<0.000000e+00> : vector<32xf32>
    %97 = vector.multi_reduction <add>, %96, %cst_39 [1] : vector<32x8xf32> to vector<32xf32>
    %98 = vector.shape_cast %97 : vector<32xf32> to vector<32x1xf32>
    %99 = vector.shape_cast %92 : vector<32x1xf32> to vector<32x1xf32>
    %100 = vector.broadcast %99 : vector<32x1xf32> to vector<32x128xf32>
    %c0_40 = arith.constant 0 : index
    %c0_41 = arith.constant 0 : index
    %101 = vector.load %arg7[%c0_40, %c0_41] : memref<32x384xf32, #tpu.memory_space<vmem>>, vector<32x128xf32>
    tpu.vector_store %arg7[%c0_40, %c0_41], %100 {strides = array<i32>} : memref<32x384xf32, #tpu.memory_space<vmem>>, vector<32x128xf32>,
    %102 = vector.shape_cast %95 : vector<32x1xf32> to vector<32x1xf32>
    %103 = vector.broadcast %102 : vector<32x1xf32> to vector<32x128xf32>
    %c0_42 = arith.constant 0 : index
    %c128 = arith.constant 128 : index
    %104 = vector.load %arg7[%c0_42, %c128] : memref<32x384xf32, #tpu.memory_space<vmem>>, vector<32x128xf32>
    tpu.vector_store %arg7[%c0_42, %c128], %103 {strides = array<i32>} : memref<32x384xf32, #tpu.memory_space<vmem>>, vector<32x128xf32>,
    %105 = vector.shape_cast %98 : vector<32x1xf32> to vector<32x1xf32>
    %106 = vector.broadcast %105 : vector<32x1xf32> to vector<32x128xf32>
    %c0_43 = arith.constant 0 : index
    %c256 = arith.constant 256 : index
    %107 = vector.load %arg7[%c0_43, %c256] : memref<32x384xf32, #tpu.memory_space<vmem>>, vector<32x128xf32>
    tpu.vector_store %arg7[%c0_43, %c256], %106 {strides = array<i32>} : memref<32x384xf32, #tpu.memory_space<vmem>>, vector<32x128xf32>,
    return
  }
  func.func @transform_0(%arg0: i32) -> (i32, i32) {
    %c0_i32 = arith.constant 0 : i32
    %c0_i32_0 = arith.constant 0 : i32
    %c0_i32_1 = arith.constant 0 : i32
    return %c0_i32, %c0_i32_0 : i32, i32
  }
  func.func @transform_1(%arg0: i32) -> (i32, i32) {
    %c0_i32 = arith.constant 0 : i32
    %c0_i32_0 = arith.constant 0 : i32
    return %arg0, %c0_i32 : i32, i32
  }
  func.func @transform_2(%arg0: i32) -> (i32, i32) {
    %c0_i32 = arith.constant 0 : i32
    %c0_i32_0 = arith.constant 0 : i32
    return %arg0, %c0_i32 : i32, i32
  }
  func.func @transform_3(%arg0: i32) -> (i32, i32) {
    %c0_i32 = arith.constant 0 : i32
    %c0_i32_0 = arith.constant 0 : i32
    return %arg0, %c0_i32 : i32, i32
  }
  func.func @transform_4(%arg0: i32) -> (i32, i32) {
    %c0_i32 = arith.constant 0 : i32
    %c0_i32_0 = arith.constant 0 : i32
    return %arg0, %c0_i32 : i32, i32
  }
  func.func @transform_5(%arg0: i32) -> (i32, i32) {
    %c0_i32 = arith.constant 0 : i32
    %c0_i32_0 = arith.constant 0 : i32
    return %arg0, %c0_i32 : i32, i32
  }
  func.func @transform_6(%arg0: i32) -> (i32, i32) {
    %c0_i32 = arith.constant 0 : i32
    %c0_i32_0 = arith.constant 0 : i32
    return %arg0, %c0_i32 : i32, i32
  }
}

</mosaic_0001>

<bundles_post_ra>
// kernel: forward.1
= control target key start
LH: loop header
LB: loop body
LE: loop exit
PB: predicated region body
PF: predicated region fallthrough
CT: control target
= control target key end

     0   :  { %s2998_s21 = smov 0   ;;  %s3494_s0 = inlined_call_operand.vmem [shape: f32[440,128], index: 0, kind: input, shape index: {}]   ;;  %s3495_s1 = inlined_call_operand.vmem [shape: f32[64,16], index: 1, kind: input, shape index: {}]   ;;  %s3496_s2 = inlined_call_operand.vmem [shape: f32[128,24], index: 2, kind: input, shape index: {}]   ;;  %s3497_s3 = inlined_call_operand.vmem [shape: f32[128,24], index: 3, kind: input, shape index: {}]   ;;  %s3498_s4 = inlined_call_operand.vmem [shape: s32[64,1], index: 4, kind: input, shape index: {}]   ;;  %s3499_s5 = inlined_call_operand.vmem [shape: s32[128,1], index: 5, kind: input, shape index: {}]   ;;  %s3500_s6 = inlined_call_operand.vmem [shape: f32[64,384], index: 6, kind: output, shape index: {}]  }
   0x1 LB: > { %s2321_s22 = sadd.s32 4294967295, %s2956_s21   ;;  %p2325_p0 = scmp.ge.s32.totalorder %s2956_s21, 1  ;;  %s2956_s21 = sphi %s2998_s21, %s16_s21  }
   0x2   : > { %p257_p1 = scmp.lt.s32.totalorder %s2956_s21, 3 }
   0x4   : > { %p258_p2 = pnand %p2325_p0, %p257_p1 }
   0x5   : > { %s2328_s23 = sshll.u32 (!%p258_p2), %s2321_s22, 3  ;;  %v345_v0 = vld [vmem:[%s3494_s0] sm:$0xff] (!%p258_p2)  ;;  %v346_v1 = vld [vmem:[%s3494_s0 + $0x8] sm:$0xff] (!%p258_p2)  ;;  %v347_v2 = vld [vmem:[%s3494_s0 + $0x10] sm:$0xff] (!%p258_p2)  ;;  %v523_v5 = vlaneseq (!%p258_p2)  ;;  %s2326_s8 = sshll.u32 (!%p258_p2), %s2321_s22, 2  ;;  %vm404_vm1 = vcmask (!%p258_p2), 130048  }
   0x6   : > { %261 = sbr.rel (%p258_p2) target bundleno = 1860 (0x744), region = 44  ;;  %p315_p3 = scmp.lt.s32.totalorder (!%p258_p2), %s2328_s23, 15  ;;  %v2810_v3 = vpack.c.bf16 (!%p258_p2), %v346_v1, %v345_v0  ;;  %v348_v4 = vld [vmem:[%s3494_s0 + $0x18] sm:$0xff] (!%p258_p2)  ;;  %v349_v7 = vld [vmem:[%s3494_s0 + $0x20] sm:$0xff] (!%p258_p2)  ;;  %v350_v8 = vld [vmem:[%s3494_s0 + $0x28] sm:$0xff] (!%p258_p2)  ;;  %v2959_v20 = vmov (!%p258_p2), 0.0  }
   0x7   : > { %v2814_v6 = vpack.c.bf16 (!%p258_p2), %v348_v4, %v347_v2  ;;  %p309_p4 = scmp.lt.s32.totalorder (!%p258_p2), %s2326_s8, 7  ;;  %v3026_v9 = vand.u32 (!%p258_p2), 127, %v523_v5  ;;  %v2818_v10 = vpack.c.bf16 (!%p258_p2), %v350_v8, %v349_v7  ;;  %v351_v11 = vld [vmem:[%s3494_s0 + $0x30] sm:$0xff] (!%p258_p2)  ;;  %v352_v14 = vld [vmem:[%s3494_s0 + $0x38] sm:$0xff] (!%p258_p2)  ;;  %s2958_s22 = smov (!%p258_p2), 16   ;;  %vm548_vm2 = vcmask (!%p258_p2), 588800  }
   0x8   : > { %2811 = vmatprep.subr.bf16.mxu0 (!%p258_p2), %v2810_v3  ;;  %v2822_v17 = vpack.c.bf16 (!%p258_p2), %v352_v14, %v351_v11  ;;  %v353_v26 = vld [vmem:[%s3494_s0 + $0x40] sm:$0xff] (!%p258_p2)  ;;  %s2960_s9 = smov (!%p258_p2), 40   ;;  %v354_v43 = vld [vmem:[%s3494_s0 + $0x48] sm:$0xff] (!%p258_p2)  ;;  %v355_v44 = vld [vmem:[%s3494_s0 + $0x50] sm:$0xff] (!%p258_p2)  ;;  %vm457_vm3 = vcmask (!%p258_p2), 326656   ;;  %vm514_vm4 = vcmask (!%p258_p2), 523264  }
   0x9   : > { %2813 = vmatpush3.bf16.msra.mxu0 (!%p258_p2), %v2810_v3  ;;  %vm525_vm0 = vcmp.eq.s32.totalorder (!%p258_p2), %v3026_v9, 71  ;;  %v356_v45 = vld [vmem:[%s3494_s0 + $0x58] sm:$0xff] (!%p258_p2)  ;;  %v2826_v47 = vpack.c.bf16 (!%p258_p2), %v355_v44, %v354_v43  ;;  %v357_v48 = vld [vmem:[%s3494_s0 + $0x60] sm:$0xff] (!%p258_p2)  ;;  %v358_v51 = vld [vmem:[%s3494_s0 + $0x68] sm:$0xff] (!%p258_p2)  ;;  %vm794_vm5 = vcmask (!%p258_p2), 850944   ;;  %vm1061_vm6 = vcmp.eq.s32.totalorder (!%p258_p2), %v3026_v9, 103 }
   0xa   : > { %2815 = vmatprep.subr.bf16.mxu0 (!%p258_p2), %v2814_v6  ;;  %v3060_v21 = vsel (!%p258_p2), %vm525_vm0, 1.0, %v2959_v20  ;;  %v2830_v50 = vpack.c.bf16 (!%p258_p2), %v357_v48, %v356_v45  ;;  %v359_v52 = vld [vmem:[%s3494_s0 + $0x70] sm:$0xff] (!%p258_p2)  ;;  %v360_v54 = vld [vmem:[%s3494_s0 + $0x78] sm:$0xff] (!%p258_p2)  ;;  %v361_v55 = vld [vmem:[%s3494_s0 + $0x80] sm:$0xff] (!%p258_p2)  ;;  %vm1082_vm7 = vcmp.lt.s32.totalorder (!%p258_p2), %v3026_v9, 32  ;;  %vm1183_vm9 = vcmp.ge.s32.totalorder (!%p258_p2), %v3026_v9, 32 }
   0xb   : > { %2827 = vmatprep.subr.bf16.mxu1 (!%p258_p2), %v2826_v47  ;;  %v2834_v53 = vpack.c.bf16 (!%p258_p2), %v359_v52, %v358_v51  ;;  %v2838_v56 = vpack.c.bf16 (!%p258_p2), %v361_v55, %v360_v54  ;;  %v362_v57 = vld [vmem:[%s3494_s0 + $0x88] sm:$0xff] (!%p258_p2)  ;;  %v363_v58 = vld [vmem:[%s3494_s0 + $0x90] sm:$0xff] (!%p258_p2)  ;;  %v364_v60 = vld [vmem:[%s3494_s0 + $0x98] sm:$0xff] (!%p258_p2)  ;;  %vm1204_vm10 = vcmp.lt.s32.totalorder (!%p258_p2), %v3026_v9, 64  ;;  %vm1265_vm13 = vcmp.ge.s32.totalorder (!%p258_p2), %v3026_v9, 64  ;;  %s2962_s30 = smov (!%p258_p2), 64  }
   0xc   : > { %2829 = vmatpush3.bf16.msra.mxu1 (!%p258_p2), %v2826_v47  ;;  %v2842_v59 = vpack.c.bf16 (!%p258_p2), %v363_v58, %v362_v57  ;;  %v365_v61 = vld [vmem:[%s3494_s0 + $0xa0] sm:$0xff] (!%p258_p2)  ;;  %v366_v63 = vld [vmem:[%s3494_s0 + $0xa8] sm:$0xff] (!%p258_p2)  ;;  %vm1103_vm8 = vmor (!%p258_p2), %vm1061_vm6, %vm1082_vm7  ;;  %vm1286_vm14 = vcmp.lt.s32.totalorder (!%p258_p2), %v3026_v9, 96 }
   0xd   : > { %s3506_s23 = smov (!%p315_p3, %s2328_s23), 15  ;;  %s3508_s8 = smov (!%p309_p4, %s2326_s8), 7  ;;  %2817 = vmatpush3.bf16.msra.mxu0 %v2814_v6  ;;  %2831 = vmatprep.subr.bf16.mxu1 %v2830_v50  ;;  %v2846_v62 = vpack.c.bf16 %v365_v61, %v364_v60  ;;  %vm1209_vm11 = vmand %vm1183_vm9, %vm1204_vm10 }
   0xe   : > { %s3024_s13 = sshll.u32 %s3506_s23, 3  ;;  %s2327_s23 = sshll.u32 %s3508_s8, 3  ;;  %2819 = vmatprep.subr.bf16.mxu0 %v2818_v10  ;;  %vm3293_vm12 = vmor %vm1061_vm6, %vm1209_vm11 }
   0xf   : > { %s3032_s16 = scalar_lea.vmem %s3496_s2, %s3024_s13  ;;  %s312_s26 = scalar_lea.vmem %s3495_s1, %s2327_s23  ;;  %vm1299_vm15 = vmand %vm1265_vm13, %vm1286_vm14  ;;  %vm1971_vm14 = vcmask 64512  }
  0x10   : > { %v409_v12 = vld [vmem:[%s3032_s16] sm:$0xff]  ;;  %v411_v13 = vld [vmem:[%s3032_s16 + $0x10] sm:$0xff]  ;;  %v410_v15 = vld [vmem:[%s3032_s16 + $0x8] sm:$0xff]  ;;  %s3078_s7 = scalar_lea.vmem %s3497_s3, %s3024_s13  ;;  %2833 = vmatpush3.bf16.msra.mxu1 %v2830_v50  ;;  %s336_s27 = scalar_lea.vmem %s3499_s5, %s3024_s13 }
  0x11   : > { %425 = vrot.lane.b32.xlu0 %v409_v12, %s2958_s22  ;;  %429 = vrot.lane.b32.xlu1 %v411_v13, %s2958_s22  ;;  %v412_v16 = vld [vmem:[%s3032_s16 + $0x18] sm:$0xff]  ;;  %v413_v18 = vld [vmem:[%s3032_s16 + $0x20] sm:$0xff]  ;;  %vm3321_vm0 = vmor %vm1061_vm6, %vm1299_vm15  ;;  %s2934_s28 = smul.u32 24, %s3508_s8 }
  0x12   : > { %v414_v19 = vld [vmem:[%s3032_s16 + $0x28] sm:$0xff]  ;;  %2821 = vmatpush3.bf16.msra.mxu0 %v2818_v10  ;;  %v400_v22 = vld [vmem:[%s312_s26] sm:$0xff]  ;;  %v402_v24 = vld [vmem:[%s312_s26 + $0x10] sm:$0xff]  ;;  %2835 = vmatprep.subr.bf16.mxu1 %v2834_v53 }
  0x13   : > { %v401_v23 = vld [vmem:[%s312_s26 + $0x8] sm:$0xff]  ;;  %2823 = vmatprep.subr.bf16.mxu0 %v2822_v17  ;;  %v405_v25 = vsel %vm404_vm1, %v400_v22, 0.0  ;;  %v407_v29 = vsel %vm404_vm1, %v402_v24, 0.0  ;;  %v403_v30 = vld [vmem:[%s312_s26 + $0x18] sm:$0xff]  ;;  %v415_v31 = vld [vmem:[%s3032_s16 + $0x30] sm:$0xff] }
  0x14   : > { %v528_v27 = vadd.f32 %v3060_v21, %v405_v25  ;;  %v406_v28 = vsel %vm404_vm1, %v401_v23, 0.0  ;;  %v416_v32 = vld [vmem:[%s3032_s16 + $0x38] sm:$0xff]  ;;  %v530_v34 = vadd.f32 %v3060_v21, %v407_v29  ;;  %v408_v35 = vsel %vm404_vm1, %v403_v30, 0.0  ;;  %v466_v36 = vld [vmem:[%s3078_s7] sm:$0xff]  ;;  %v467_v37 = vld [vmem:[%s3078_s7 + $0x8] sm:$0xff]  ;;  %2837 = vmatpush3.bf16.msra.mxu1 %v2834_v53 }
  0x15   : > { %427 = vrot.lane.b32.xlu0 %v410_v15, %s2958_s22  ;;  %431 = vrot.lane.b32.xlu1 %v412_v16, %s2958_s22  ;;  %v529_v33 = vadd.f32 %v3060_v21, %v406_v28  ;;  %v531_v38 = vadd.f32 %v3060_v21, %v408_v35  ;;  %v468_v39 = vld [vmem:[%s3078_s7 + $0x10] sm:$0xff]  ;;  %v469_v40 = vld [vmem:[%s3078_s7 + $0x18] sm:$0xff] }
  0x16   : > { %2825 = vmatpush3.bf16.msra.mxu0 %v2822_v17  ;;  %2590 = vmatprep.mubr.msk.f32.mxu0 %vm548_vm2, %v528_v27  ;;  %v470_v41 = vld [vmem:[%s3078_s7 + $0x20] sm:$0xff]  ;;  %v471_v42 = vld [vmem:[%s3078_s7 + $0x28] sm:$0xff]  ;;  %v472_v46 = vld [vmem:[%s3078_s7 + $0x30] sm:$0xff] }
  0x17   : > { %2588 = vmatprep.subr.mxu0 %v353_v26  ;;  %v473_v49 = vld [vmem:[%s3078_s7 + $0x38] sm:$0xff]  ;;  %2839 = vmatprep.subr.bf16.mxu1 %v2838_v56  ;;  %s3467_s7 = scalar_lea.vmem %s3500_s6, %s2934_s28 }
  0x18   : > { %2841 = vmatpush3.bf16.msra.mxu1 %v2838_v56 }
  0x19   : > { %433 = vrot.lane.b32.xlu0 %v413_v18, %s2958_s22  ;;  %435 = vrot.lane.b32.xlu1 %v414_v19, %s2958_s22 }
  0x1a   : > { %2589 = vmatpush3.msra.mxu0 %v353_v26  ;;  %2843 = vmatprep.subr.bf16.mxu1 %v2842_v59 }
  0x1b   : > { %2591 = vmatmul.mubr.msk.f32.vlgmr.msra.gmra.mrb[0].mxu0 %vm548_vm2, %v529_v33 }
  0x1c   : > { %2593 = vmatprep.mubr.msk.f32.mxu0 %vm548_vm2, %v530_v34  ;;  %2845 = vmatpush3.bf16.msra.mxu1 %v2842_v59 }
  0x1d   : > { %437 = vrot.lane.b32.xlu0 %v415_v31, %s2958_s22  ;;  %439 = vrot.lane.b32.xlu1 %v416_v32, %s2958_s22 }
  0x1e   : > { %2847 = vmatprep.subr.bf16.mxu1 %v2846_v62 }
  0x1f   : > { %2594 = vmatmul.mubr.msk.f32.gmra.mrb[2].mxu0 %vm548_vm2, %v531_v38 }
  0x20   : > { %2849 = vmatpush3.bf16.msra.mxu1 %v2846_v62 }
  0x21   : > { %482 = vrot.lane.b32.xlu0 %v466_v36, %s2960_s9  ;;  %484 = vrot.lane.b32.xlu1 %v467_v37, %s2960_s9 }
  0x22   : > { %2644 = vmatprep.subr.mxu1 %v366_v63 }
  0x24   : > { %2645 = vmatpush3.msra.mxu1 %v366_v63 }
  0x25   : > { %486 = vrot.lane.b32.xlu0 %v468_v39, %s2960_s9  ;;  %488 = vrot.lane.b32.xlu1 %v469_v40, %s2960_s9 }
  0x29   : > { %490 = vrot.lane.b32.xlu0 %v470_v41, %s2960_s9  ;;  %492 = vrot.lane.b32.xlu1 %v471_v42, %s2960_s9 }
  0x2d   : > { %494 = vrot.lane.b32.xlu0 %v472_v46, %s2960_s9  ;;  %496 = vrot.lane.b32.xlu1 %v473_v49, %s2960_s9  ;;  %s330_s9 = scalar_lea.vmem %s3498_s4, %s2327_s23 }
  0x83   : > { %v426_v0 = vpop.permute.xlu0 %425  ;;  %v430_v1 = vpop.permute.xlu1 %429 }
  0x84   : > { %v449_v2 = vsel %vm404_vm1, 0.0, %v426_v0  ;;  %v451_v3 = vsel %vm404_vm1, 0.0, %v430_v1 }
  0x85   : > { %v458_v4 = vsel %vm457_vm3, %v449_v2, 0.0  ;;  %v460_v6 = vsel %vm457_vm3, %v451_v3, 0.0 }
  0x86   : > { %v532_v5 = vadd.f32 %v3060_v21, %v458_v4  ;;  %v534_v12 = vadd.f32 %v3060_v21, %v460_v6 }
  0x87   : > { %v428_v7 = vpop.permute.xlu0 %427  ;;  %v432_v8 = vpop.permute.xlu1 %431 }
  0x88   : > { %v450_v10 = vsel %vm404_vm1, 0.0, %v428_v7  ;;  %2596 = vmatprep.mubr.msk.f32.mxu0 %vm548_vm2, %v532_v5  ;;  %v452_v11 = vsel %vm404_vm1, 0.0, %v432_v8 }
  0x89   : > { %v459_v13 = vsel %vm457_vm3, %v450_v10, 0.0  ;;  %v461_v14 = vsel %vm457_vm3, %v452_v11, 0.0 }
  0x8a   : > { %v533_v15 = vadd.f32 %v3060_v21, %v459_v13  ;;  %v535_v18 = vadd.f32 %v3060_v21, %v461_v14  ;;  %v369_v13 = vld [vmem:[%s3494_s0 + $0xc0] sm:$0xff] }
  0x8b   : > { %v434_v16 = vpop.permute.xlu0 %433  ;;  %v436_v17 = vpop.permute.xlu1 %435 }
  0x8c   : > { %2597 = vmatmul.mubr.msk.f32.gmra.mrb[4].mxu0 %vm548_vm2, %v533_v15  ;;  %v453_v19 = vsel %vm404_vm1, 0.0, %v434_v16  ;;  %v454_v22 = vsel %vm404_vm1, 0.0, %v436_v17  ;;  %v370_v15 = vld [vmem:[%s3494_s0 + $0xc8] sm:$0xff]  ;;  %v371_v17 = vld [vmem:[%s3494_s0 + $0xd0] sm:$0xff] }
  0x8d   : > { %2599 = vmatprep.mubr.msk.f32.mxu0 %vm548_vm2, %v534_v12  ;;  %v462_v23 = vsel %vm457_vm3, %v453_v19, 0.0  ;;  %v463_v24 = vsel %vm457_vm3, %v454_v22, 0.0  ;;  %v368_v12 = vld [vmem:[%s3494_s0 + $0xb8] sm:$0xff]  ;;  %v2854_v16 = vpack.c.bf16 %v370_v15, %v369_v13  ;;  %v373_v22 = vld [vmem:[%s3494_s0 + $0xe0] sm:$0xff]  ;;  %v1597_v13 = vld [vmem:[%s336_s27 + $0x8] sm:$0xff] }
  0x8e   : > { %v536_v25 = vadd.f32 %v3060_v21, %v462_v23  ;;  %v537_v28 = vadd.f32 %v3060_v21, %v463_v24  ;;  %v374_v23 = vld [vmem:[%s3494_s0 + $0xe8] sm:$0xff]  ;;  %v1598_v15 = vld [vmem:[%s336_s27 + $0x10] sm:$0xff] }
  0x8f   : > { %v438_v26 = vpop.permute.xlu0 %437  ;;  %v440_v27 = vpop.permute.xlu1 %439  ;;  %v2862_v24 = vpack.c.bf16 %v374_v23, %v373_v22  ;;  %v1603_v22 = vld [vmem:[%s336_s27 + $0x38] sm:$0xff] }
  0x90   : > { %2600 = vmatmul.mubr.msk.f32.gmra.mrb[6].mxu0 %vm548_vm2, %v535_v18  ;;  %v455_v29 = vsel %vm404_vm1, 0.0, %v438_v26  ;;  %v456_v30 = vsel %vm404_vm1, 0.0, %v440_v27  ;;  %v372_v18 = vld [vmem:[%s3494_s0 + $0xd8] sm:$0xff] }
  0x91   : > { %v464_v31 = vsel %vm457_vm3, %v455_v29, 0.0  ;;  %v465_v32 = vsel %vm457_vm3, %v456_v30, 0.0  ;;  %2602 = vmatprep.mubr.msk.f32.mxu0 %vm548_vm2, %v536_v25  ;;  %v2858_v19 = vpack.c.bf16 %v372_v18, %v371_v17  ;;  %v375_v25 = vld [vmem:[%s3494_s0 + $0xf0] sm:$0xff]  ;;  %v376_v26 = vld [vmem:[%s3494_s0 + $0xf8] sm:$0xff]  ;;  %v378_v29 = vld [vmem:[%s3494_s0 + $0x108] sm:$0xff] }
  0x92   : > { %v538_v33 = vadd.f32 %v3060_v21, %v464_v31  ;;  %v539_v36 = vadd.f32 %v3060_v21, %v465_v32  ;;  %v2866_v27 = vpack.c.bf16 %v376_v26, %v375_v25  ;;  %v379_v31 = vld [vmem:[%s3494_s0 + $0x110] sm:$0xff]  ;;  %v1600_v17 = vld [vmem:[%s336_s27 + $0x20] sm:$0xff]  ;;  %v1601_v18 = vld [vmem:[%s336_s27 + $0x28] sm:$0xff] }
  0x93   : > { %v483_v34 = vpop.permute.xlu0 %482  ;;  %v485_v35 = vpop.permute.xlu1 %484  ;;  %v380_v23 = vld [vmem:[%s3494_s0 + $0x118] sm:$0xff]  ;;  %v382_v25 = vld [vmem:[%s3494_s0 + $0x128] sm:$0xff] }
  0x94   : > { %2603 = vmatmul.mubr.msk.f32.gmra.mrb[8].mxu0 %vm548_vm2, %v537_v28  ;;  %v506_v37 = vsel %vm457_vm3, 0.0, %v483_v34  ;;  %v507_v38 = vsel %vm457_vm3, 0.0, %v485_v35  ;;  %v377_v28 = vld [vmem:[%s3494_s0 + $0x100] sm:$0xff] }
  0x95   : > { %v515_v39 = vsel %vm514_vm4, %v506_v37, 0.0  ;;  %v516_v40 = vsel %vm514_vm4, %v507_v38, 0.0  ;;  %2605 = vmatprep.mubr.msk.f32.mxu0 %vm548_vm2, %v538_v33  ;;  %v2870_v30 = vpack.c.bf16 %v378_v29, %v377_v28  ;;  %v384_v29 = vld [vmem:[%s3494_s0 + $0x138] sm:$0xff] }
  0x96   : > { %v540_v41 = vadd.f32 %v3060_v21, %v515_v39  ;;  %v541_v44 = vadd.f32 %v3060_v21, %v516_v40 }
  0x97   : > { %v487_v42 = vpop.permute.xlu0 %486  ;;  %v489_v43 = vpop.permute.xlu1 %488 }
  0x98   : > { %2606 = vmatmul.mubr.msk.f32.gmra.mrb[10].mxu0 %vm548_vm2, %v539_v36  ;;  %v508_v45 = vsel %vm457_vm3, 0.0, %v487_v42  ;;  %v509_v46 = vsel %vm457_vm3, 0.0, %v489_v43 }
  0x99   : > { %v517_v47 = vsel %vm514_vm4, %v508_v45, 0.0  ;;  %v518_v48 = vsel %vm514_vm4, %v509_v46, 0.0  ;;  %2608 = vmatprep.mubr.msk.f32.mxu0 %vm548_vm2, %v540_v41 }
  0x9a   : > { %v542_v49 = vadd.f32 %v3060_v21, %v517_v47  ;;  %v543_v52 = vadd.f32 %v3060_v21, %v518_v48 }
  0x9b   : > { %v491_v50 = vpop.permute.xlu0 %490  ;;  %v493_v51 = vpop.permute.xlu1 %492 }
  0x9c   : > { %2609 = vmatmul.mubr.msk.f32.gmra.mrb[12].mxu0 %vm548_vm2, %v541_v44  ;;  %v510_v53 = vsel %vm457_vm3, 0.0, %v491_v50  ;;  %v511_v54 = vsel %vm457_vm3, 0.0, %v493_v51 }
  0x9d   : > { %v519_v55 = vsel %vm514_vm4, %v510_v53, 0.0  ;;  %v520_v56 = vsel %vm514_vm4, %v511_v54, 0.0  ;;  %2611 = vmatprep.mubr.msk.f32.mxu0 %vm548_vm2, %v542_v49 }
  0x9e   : > { %v544_v57 = vadd.f32 %v3060_v21, %v519_v55  ;;  %v545_v60 = vadd.f32 %v3060_v21, %v520_v56 }
  0x9f   : > { %v495_v58 = vpop.permute.xlu0 %494  ;;  %v497_v59 = vpop.permute.xlu1 %496 }
  0xa0   : > { %2612 = vmatmul.mubr.msk.f32.gmra.mrb[14].mxu0 %vm548_vm2, %v543_v52  ;;  %v512_v61 = vsel %vm457_vm3, 0.0, %v495_v58  ;;  %v513_v62 = vsel %vm457_vm3, 0.0, %v497_v59 }
  0xa1   : > { %v521_v63 = vsel %vm514_vm4, %v512_v61, 0.0  ;;  %v522_v0 = vsel %vm514_vm4, %v513_v62, 0.0  ;;  %2614 = vmatprep.mubr.msk.f32.mxu0 %vm548_vm2, %v544_v57 }
  0xa2   : > { %v546_v1 = vadd.f32 %v3060_v21, %v521_v63  ;;  %v547_v2 = vadd.f32 %v3060_v21, %v522_v0  ;;  %v367_v21 = vld [vmem:[%s3494_s0 + $0xb0] sm:$0xff] }
  0xa3   : > { %v2850_v14 = vpack.c.bf16 %v368_v12, %v367_v21  ;;  %v2961_v12 = vmov 0  }
  0xa4   : > { %2615 = vmatmul.mubr.msk.f32.gmra.mrb[16].mxu0 %vm548_vm2, %v545_v60  ;;  %2949 = vset.pattern.permute.xlu1 %v2961_v12 }
  0xa5   : > { %2617 = vmatprep.mubr.msk.f32.mxu0 %vm548_vm2, %v546_v1  ;;  %2851 = vmatprep.subr.bf16.mxu0 %v2850_v14 }
  0xa6   : > { %2853 = vmatpush3.bf16.msra.mxu0 %v2850_v14  ;;  %2948 = vset.pattern.permute.xlu0 %v2961_v12  ;;  %v1596_v14 = vld [vmem:[%s336_s27] sm:$0xff] }
  0xa7   : > { %2855 = vmatprep.subr.bf16.mxu0 %v2854_v16  ;;  %1633 = vperm.xlu1 %2949, %v1597_v13  }
  0xa8   : > { %2618 = vmatmul.mubr.msk.f32.gmra.mrb[18].mxu0 %vm548_vm2, %v547_v2  ;;  %1630 = vperm.xlu0 %2948, %v1596_v14  }
  0xaa   : > { %2857 = vmatpush3.bf16.msra.mxu0 %v2854_v16  ;;  %v1599_v16 = vld [vmem:[%s336_s27 + $0x18] sm:$0xff] }
  0xab   : > { %2859 = vmatprep.subr.bf16.mxu0 %v2858_v19  ;;  %1636 = vperm.xlu1 %2949, %v1598_v15  }
  0xac   : > { %1639 = vperm.xlu0 %2948, %v1599_v16  }
  0xae   : > { %2861 = vmatpush3.bf16.msra.mxu0 %v2858_v19  ;;  %v1602_v19 = vld [vmem:[%s336_s27 + $0x30] sm:$0xff] }
  0xaf   : > { %2863 = vmatprep.subr.bf16.mxu0 %v2862_v24  ;;  %1642 = vperm.xlu1 %2949, %v1600_v17  }
  0xb0   : > { %1645 = vperm.xlu0 %2948, %v1601_v18   ;;  %v386_v18 = vld [vmem:[%s3494_s0 + $0x148] sm:$0xff] }
  0xb2   : > { %2865 = vmatpush3.bf16.msra.mxu0 %v2862_v24  ;;  %v381_v24 = vld [vmem:[%s3494_s0 + $0x120] sm:$0xff] }
  0xb3   : > { %2867 = vmatprep.subr.bf16.mxu0 %v2866_v27  ;;  %1648 = vperm.xlu1 %2949, %v1602_v19   ;;  %v2874_v26 = vpack.c.bf16 %v381_v24, %v380_v23  ;;  %v387_v19 = vld [vmem:[%s3494_s0 + $0x150] sm:$0xff] }
  0xb4   : > { %1651 = vperm.xlu0 %2948, %v1603_v22   ;;  %v2886_v22 = vpack.c.bf16 %v387_v19, %v386_v18  ;;  %v390_v18 = vld [vmem:[%s3494_s0 + $0x168] sm:$0xff]  ;;  %v391_v19 = vld [vmem:[%s3494_s0 + $0x170] sm:$0xff] }
  0xb5   : > { %2875 = vmatprep.subr.bf16.mxu1 %v2874_v26 }
  0xb6   : > { %2869 = vmatpush3.bf16.msra.mxu0 %v2866_v27  ;;  %v383_v27 = vld [vmem:[%s3494_s0 + $0x130] sm:$0xff] }
  0xb7   : > { %2871 = vmatprep.subr.bf16.mxu0 %v2870_v30  ;;  %v2878_v28 = vpack.c.bf16 %v383_v27, %v382_v25 }
  0xba   : > { %2873 = vmatpush3.bf16.msra.mxu0 %v2870_v30  ;;  %v385_v30 = vld [vmem:[%s3494_s0 + $0x140] sm:$0xff] }
  0xbb   : > { %2700 = vmatprep.subr.mxu0 %v379_v31 }
  0xbe   : > { %2701 = vmatpush3.msra.mxu0 %v379_v31  ;;  %v2882_v31 = vpack.c.bf16 %v385_v30, %v384_v29  ;;  %v1628_v29 = vand.u32 7, %v3026_v9 }
  0xee   : > { %v2592_v3 = vpop.f32.mrb[0].mxu0 }
  0xef   : > { %v775_v4 = vmax.f32 %v2592_v3, 0.0  ;;  %v675_v5 = vpop.f32.mrb[1].mxu0 }
  0xf0   : > { %v774_v6 = vmax.f32 %v675_v5, 0.0 }
  0xf2   : > { %v2595_v7 = vpop.f32.mrb[2].mxu0  ;;  %2646 = vmatprep.mubr.msk.f32.mxu1 %vm794_vm5, %v774_v6 }
  0xf3   : > { %v777_v8 = vmax.f32 %v2595_v7, 0.0  ;;  %v685_v10 = vpop.f32.mrb[3].mxu0  ;;  %2647 = vmatmul.mubr.msk.f32.vlgmr.msra.gmra.mrb[0].mxu1 %vm794_vm5, %v775_v4 }
  0xf4   : > { %v776_v11 = vmax.f32 %v685_v10, 0.0  ;;  %2877 = vmatpush3.bf16.msra.mxu1 %v2874_v26 }
  0xf5   : > { %2879 = vmatprep.subr.bf16.mxu1 %v2878_v28 }
  0xf6   : > { %2649 = vmatprep.mubr.msk.f32.mxu1 %vm794_vm5, %v776_v11 }
  0xf7   : > { %2650 = vmatmul.mubr.msk.f32.gmra.mrb[2].mxu1 %vm794_vm5, %v777_v8 }
  0xf8   : > { %2881 = vmatpush3.bf16.msra.mxu1 %v2878_v28 }
  0xf9   : > { %2883 = vmatprep.subr.bf16.mxu1 %v2882_v31 }
  0xfc   : > { %2885 = vmatpush3.bf16.msra.mxu1 %v2882_v31 }
  0xfd   : > { %2887 = vmatprep.subr.bf16.mxu1 %v2886_v22 }
 0x100   : > { %2889 = vmatpush3.bf16.msra.mxu1 %v2886_v22 }
 0x126   : > { %v1634_v27 = vpop.permute.xlu1 %1633 }
 0x127   : > { %v1631_v28 = vpop.permute.xlu0 %1630  ;;  %vm1654_vm2 = vcmp.eq.s32.totalorder %v1628_v29, %v1634_v27 }
 0x128   : > { %vm1653_vm1 = vcmp.eq.s32.totalorder %v1628_v29, %v1631_v28 }
 0x12a   : > { %v1637_v30 = vpop.permute.xlu1 %1636 }
 0x12b   : > { %v1640_v31 = vpop.permute.xlu0 %1639  ;;  %vm1655_vm3 = vcmp.eq.s32.totalorder %v1628_v29, %v1637_v30  ;;  %v1593_v30 = vld [vmem:[%s330_s9 + $0x8] sm:$0xff] }
 0x15f   : > { %v2598_v32 = vpop.f32.mrb[4].mxu0 }
 0x160   : > { %v695_v33 = vpop.f32.mrb[5].mxu0  ;;  %v779_v35 = vmax.f32 %v2598_v32, 0.0 }
 0x161   : > { %v778_v34 = vmax.f32 %v695_v33, 0.0 }
 0x163   : > { %v2601_v36 = vpop.f32.mrb[6].mxu0  ;;  %2652 = vmatprep.mubr.msk.f32.mxu1 %vm794_vm5, %v778_v34 }
 0x164   : > { %v705_v37 = vpop.f32.mrb[7].mxu0  ;;  %2653 = vmatmul.mubr.msk.f32.gmra.mrb[4].mxu1 %vm794_vm5, %v779_v35  ;;  %v781_v39 = vmax.f32 %v2601_v36, 0.0 }
 0x165   : > { %v780_v38 = vmax.f32 %v705_v37, 0.0 }
 0x167   : > { %v2604_v40 = vpop.f32.mrb[8].mxu0  ;;  %2655 = vmatprep.mubr.msk.f32.mxu1 %vm794_vm5, %v780_v38 }
 0x168   : > { %v715_v41 = vpop.f32.mrb[9].mxu0  ;;  %2656 = vmatmul.mubr.msk.f32.gmra.mrb[6].mxu1 %vm794_vm5, %v781_v39  ;;  %v783_v43 = vmax.f32 %v2604_v40, 0.0 }
 0x169   : > { %v782_v42 = vmax.f32 %v715_v41, 0.0 }
 0x16b   : > { %v2607_v44 = vpop.f32.mrb[10].mxu0  ;;  %2658 = vmatprep.mubr.msk.f32.mxu1 %vm794_vm5, %v782_v42 }
 0x16c   : > { %v725_v45 = vpop.f32.mrb[11].mxu0  ;;  %2659 = vmatmul.mubr.msk.f32.gmra.mrb[8].mxu1 %vm794_vm5, %v783_v43  ;;  %v785_v47 = vmax.f32 %v2607_v44, 0.0 }
 0x16d   : > { %v784_v46 = vmax.f32 %v725_v45, 0.0 }
 0x16f   : > { %v2610_v48 = vpop.f32.mrb[12].mxu0  ;;  %2661 = vmatprep.mubr.msk.f32.mxu1 %vm794_vm5, %v784_v46 }
 0x170   : > { %v735_v49 = vpop.f32.mrb[13].mxu0  ;;  %2662 = vmatmul.mubr.msk.f32.gmra.mrb[10].mxu1 %vm794_vm5, %v785_v47  ;;  %v787_v51 = vmax.f32 %v2610_v48, 0.0 }
 0x171   : > { %v786_v50 = vmax.f32 %v735_v49, 0.0 }
 0x173   : > { %v2613_v52 = vpop.f32.mrb[14].mxu0  ;;  %2664 = vmatprep.mubr.msk.f32.mxu1 %vm794_vm5, %v786_v50 }
 0x174   : > { %v745_v53 = vpop.f32.mrb[15].mxu0  ;;  %2665 = vmatmul.mubr.msk.f32.gmra.mrb[12].mxu1 %vm794_vm5, %v787_v51  ;;  %v789_v55 = vmax.f32 %v2613_v52, 0.0 }
 0x175   : > { %v788_v54 = vmax.f32 %v745_v53, 0.0 }
 0x177   : > { %v2616_v56 = vpop.f32.mrb[16].mxu0  ;;  %2667 = vmatprep.mubr.msk.f32.mxu1 %vm794_vm5, %v788_v54 }
 0x178   : > { %v755_v57 = vpop.f32.mrb[17].mxu0  ;;  %2668 = vmatmul.mubr.msk.f32.gmra.mrb[14].mxu1 %vm794_vm5, %v789_v55  ;;  %v791_v59 = vmax.f32 %v2616_v56, 0.0 }
 0x179   : > { %v790_v58 = vmax.f32 %v755_v57, 0.0 }
 0x17b   : > { %v2619_v60 = vpop.f32.mrb[18].mxu0  ;;  %2670 = vmatprep.mubr.msk.f32.mxu1 %vm794_vm5, %v790_v58 }
 0x17c   : > { %v765_v61 = vpop.f32.mrb[19].mxu0  ;;  %2671 = vmatmul.mubr.msk.f32.gmra.mrb[16].mxu1 %vm794_vm5, %v791_v59  ;;  %v793_v63 = vmax.f32 %v2619_v60, 0.0 }
 0x17d   : > { %v792_v62 = vmax.f32 %v765_v61, 0.0 }
 0x17f   : > { %2673 = vmatprep.mubr.msk.f32.mxu1 %vm794_vm5, %v792_v62 }
 0x180   : > { %2674 = vmatmul.mubr.msk.f32.gmra.mrb[18].mxu1 %vm794_vm5, %v793_v63 }
 0x1c6   : > { %v2648_v0 = vpop.f32.mrb[0].mxu1 }
 0x1c7   : > { %v1021_v1 = vmax.f32 %v2648_v0, 0.0  ;;  %v921_v2 = vpop.f32.mrb[1].mxu1 }
 0x1c8   : > { %v1020_v3 = vmax.f32 %v921_v2, 0.0 }
 0x1c9   : > { %v1328_v4 = vsel %vm1103_vm8, %v1021_v1, 0.0 }
 0x1ca   : > { %v1327_v5 = vsel %vm1103_vm8, %v1020_v3, 0.0  ;;  %v2651_v6 = vpop.f32.mrb[2].mxu1 }
 0x1cb   : > { %v1023_v7 = vmax.f32 %v2651_v6, 0.0  ;;  %v931_v8 = vpop.f32.mrb[3].mxu1  ;;  %2702 = vmatprep.mubr.msk.f32.mxu0 %vm794_vm5, %v1327_v5 }
 0x1cc   : > { %v1022_v10 = vmax.f32 %v931_v8, 0.0  ;;  %2703 = vmatmul.mubr.msk.f32.vlgmr.msra.gmra.mrb[20].mxu0 %vm794_vm5, %v1328_v4 }
 0x1cd   : > { %v1330_v11 = vsel %vm1103_vm8, %v1023_v7, 0.0 }
 0x1ce   : > { %v1329_v21 = vsel %vm1103_vm8, %v1022_v10, 0.0 }
 0x1cf   : > { %2705 = vmatprep.mubr.msk.f32.mxu0 %vm794_vm5, %v1329_v21 }
 0x1d0   : > { %2706 = vmatmul.mubr.msk.f32.gmra.mrb[22].mxu0 %vm794_vm5, %v1330_v11 }
 0x237   : > { %v2654_v33 = vpop.f32.mrb[4].mxu1 }
 0x238   : > { %v1025_v34 = vmax.f32 %v2654_v33, 0.0  ;;  %v941_v35 = vpop.f32.mrb[5].mxu1  ;;  %v2403_v33 = vsel %vm1653_vm1, 1.0, %v2959_v20 }
 0x239   : > { %v1024_v36 = vmax.f32 %v941_v35, 0.0 }
 0x23a   : > { %v1332_v37 = vsel %vm3293_vm12, %v1025_v34, 0.0 }
 0x23b   : > { %v1331_v38 = vsel %vm3293_vm12, %v1024_v36, 0.0  ;;  %v2657_v39 = vpop.f32.mrb[6].mxu1  ;;  %v2404_v36 = vsel %vm1654_vm2, 1.0, %v2959_v20 }
 0x23c   : > { %v1027_v40 = vmax.f32 %v2657_v39, 0.0  ;;  %v951_v41 = vpop.f32.mrb[7].mxu1  ;;  %2708 = vmatprep.mubr.msk.f32.mxu0 %vm794_vm5, %v1331_v38  ;;  %v1643_v38 = vpop.permute.xlu1 %1642 }
 0x23d   : > { %v1026_v42 = vmax.f32 %v951_v41, 0.0  ;;  %2709 = vmatmul.mubr.msk.f32.gmra.mrb[24].mxu0 %vm794_vm5, %v1332_v37  ;;  %v1646_v39 = vpop.permute.xlu0 %1645  ;;  %vm1657_vm6 = vcmp.eq.s32.totalorder %v1628_v29, %v1643_v38  ;;  %v392_v38 = vld [vmem:[%s3494_s0 + $0x178] sm:$0xff] }
 0x23e   : > { %v1334_v43 = vsel %vm3293_vm12, %v1027_v40, 0.0  ;;  %vm1658_vm7 = vcmp.eq.s32.totalorder %v1628_v29, %v1646_v39  ;;  %v2407_v56 = vsel %vm1657_vm6, 1.0, %v2959_v20 }
 0x23f   : > { %v1333_v44 = vsel %vm3293_vm12, %v1026_v42, 0.0  ;;  %v2660_v45 = vpop.f32.mrb[8].mxu1 }
 0x240   : > { %v1029_v46 = vmax.f32 %v2660_v45, 0.0  ;;  %v961_v47 = vpop.f32.mrb[9].mxu1  ;;  %2711 = vmatprep.mubr.msk.f32.mxu0 %vm794_vm5, %v1333_v44 }
 0x241   : > { %v1028_v48 = vmax.f32 %v961_v47, 0.0  ;;  %2712 = vmatmul.mubr.msk.f32.gmra.mrb[26].mxu0 %vm794_vm5, %v1334_v43 }
 0x242   : > { %v1336_v49 = vsel %vm3293_vm12, %v1029_v46, 0.0  ;;  %v2405_v46 = vsel %vm1655_vm3, 1.0, %v2959_v20 }
 0x243   : > { %v1335_v50 = vsel %vm3293_vm12, %v1028_v48, 0.0  ;;  %v2663_v51 = vpop.f32.mrb[10].mxu1 }
 0x244   : > { %v1031_v52 = vmax.f32 %v2663_v51, 0.0  ;;  %v971_v53 = vpop.f32.mrb[11].mxu1  ;;  %2714 = vmatprep.mubr.msk.f32.mxu0 %vm794_vm5, %v1335_v50  ;;  %v1649_v50 = vpop.permute.xlu1 %1648 }
 0x245   : > { %v1030_v54 = vmax.f32 %v971_v53, 0.0  ;;  %2715 = vmatmul.mubr.msk.f32.gmra.mrb[28].mxu0 %vm794_vm5, %v1336_v49  ;;  %vm1659_vm8 = vcmp.eq.s32.totalorder %v1628_v29, %v1649_v50 }
 0x246   : > { %v1338_v55 = vsel %vm3293_vm12, %v1031_v52, 0.0 }
 0x247   : > { %v1337_v57 = vsel %vm3293_vm12, %v1030_v54, 0.0  ;;  %v2666_v58 = vpop.f32.mrb[12].mxu1  ;;  %v1652_v54 = vpop.permute.xlu0 %1651 }
 0x248   : > { %v1033_v59 = vmax.f32 %v2666_v58, 0.0  ;;  %v981_v60 = vpop.f32.mrb[13].mxu1  ;;  %2717 = vmatprep.mubr.msk.f32.mxu0 %vm794_vm5, %v1337_v57  ;;  %v2408_v57 = vsel %vm1658_vm7, 1.0, %v2959_v20  ;;  %vm1660_vm9 = vcmp.eq.s32.totalorder %v1628_v29, %v1652_v54 }
 0x249   : > { %v1032_v61 = vmax.f32 %v981_v60, 0.0  ;;  %2718 = vmatmul.mubr.msk.f32.gmra.mrb[30].mxu0 %vm794_vm5, %v1338_v55 }
 0x24a   : > { %v1340_v62 = vsel %vm3321_vm0, %v1033_v59, 0.0 }
 0x24b   : > { %v1339_v63 = vsel %vm3321_vm0, %v1032_v61, 0.0  ;;  %v2669_v0 = vpop.f32.mrb[14].mxu1 }
 0x24c   : > { %v1035_v1 = vmax.f32 %v2669_v0, 0.0  ;;  %v991_v2 = vpop.f32.mrb[15].mxu1  ;;  %2720 = vmatprep.mubr.msk.f32.mxu0 %vm794_vm5, %v1339_v63  ;;  %v2409_v0 = vsel %vm1659_vm8, 1.0, %v2959_v20 }
 0x24d   : > { %v1034_v3 = vmax.f32 %v991_v2, 0.0  ;;  %2721 = vmatmul.mubr.msk.f32.gmra.mrb[24].mxu0 %vm794_vm5, %v1340_v62 }
 0x24e   : > { %v1342_v4 = vsel %vm3321_vm0, %v1035_v1, 0.0  ;;  %v2410_v1 = vsel %vm1660_vm9, 1.0, %v2959_v20 }
 0x24f   : > { %v1341_v5 = vsel %vm3321_vm0, %v1034_v3, 0.0  ;;  %v2672_v6 = vpop.f32.mrb[16].mxu1 }
 0x250   : > { %v1037_v7 = vmax.f32 %v2672_v6, 0.0  ;;  %v1001_v8 = vpop.f32.mrb[17].mxu1  ;;  %2723 = vmatprep.mubr.msk.f32.mxu0 %vm794_vm5, %v1341_v5 }
 0x251   : > { %v1036_v10 = vmax.f32 %v1001_v8, 0.0  ;;  %2724 = vmatmul.mubr.msk.f32.gmra.mrb[26].mxu0 %vm794_vm5, %v1342_v4  ;;  %v388_v4 = vld [vmem:[%s3494_s0 + $0x158] sm:$0xff] }
 0x252   : > { %v1344_v11 = vsel %vm3321_vm0, %v1037_v7, 0.0 }
 0x253   : > { %v1343_v21 = vsel %vm3321_vm0, %v1036_v10, 0.0  ;;  %v2675_v12 = vpop.f32.mrb[18].mxu1 }
 0x254   : > { %v1039_v13 = vmax.f32 %v2675_v12, 0.0  ;;  %v1011_v14 = vpop.f32.mrb[19].mxu1  ;;  %2726 = vmatprep.mubr.msk.f32.mxu0 %vm794_vm5, %v1343_v21 }
 0x255   : > { %v1038_v15 = vmax.f32 %v1011_v14, 0.0  ;;  %2727 = vmatmul.mubr.msk.f32.gmra.mrb[28].mxu0 %vm794_vm5, %v1344_v11 }
 0x256   : > { %v1346_v16 = vsel %vm3321_vm0, %v1039_v13, 0.0 }
 0x257   : > { %v1345_v17 = vsel %vm3321_vm0, %v1038_v15, 0.0 }
 0x258   : > { %2729 = vmatprep.mubr.msk.f32.mxu0 %vm794_vm5, %v1345_v17  ;;  %v389_v17 = vld [vmem:[%s3494_s0 + $0x160] sm:$0xff] }
 0x259   : > { %2730 = vmatmul.mubr.msk.f32.gmra.mrb[30].mxu0 %vm794_vm5, %v1346_v16  ;;  %vm1656_vm5 = vcmp.eq.s32.totalorder %v1628_v29, %v1640_v31  ;;  %v1592_v31 = vld [vmem:[%s330_s9] sm:$0xff] }
 0x25a   : > { %v2406_v47 = vsel %vm1656_vm5, 1.0, %v2959_v20 }
 0x29f   : > { %v3359_v23 = vpop.f32.mrb[20].mxu0 }
 0x2a0   : > { %v3361_v24 = vpop.f32.mrb[21].mxu0 }
 0x2a3   : > { %v3363_v25 = vpop.f32.mrb[22].mxu0 }
 0x2a4   : > { %v3365_v26 = vpop.f32.mrb[23].mxu0 }
 0x320   : > { %v2722_v32 = vpop.f32.mrb[24].mxu0 }
 0x321   : > { %v1585_v34 = vand.u32 2147483647, %v2722_v32  ;;  %v1533_v35 = vpop.f32.mrb[25].mxu0  ;;  %v1595_v32 = vld [vmem:[%s330_s9 + $0x18] sm:$0xff] }
 0x322   : > { %v1584_v37 = vand.u32 2147483647, %v1533_v35  ;;  %v1572_v35 = vand.u32 2147483647, %v3361_v24  ;;  %v396_v24 = vld [vmem:[%s3494_s0 + $0x198] sm:$0xff] }
 0x323   : > { %v1678_v42 = vmul.f32 %v2404_v36, %v1585_v34  ;;  %v1573_v34 = vand.u32 2147483647, %v3359_v23  ;;  %v1575_v36 = vand.u32 2147483647, %v3363_v25 }
 0x324   : > { %v1677_v40 = vmul.f32 %v2403_v33, %v1584_v37  ;;  %v2725_v41 = vpop.f32.mrb[26].mxu0  ;;  %v1594_v33 = vld [vmem:[%s330_s9 + $0x10] sm:$0xff]  ;;  %v1574_v37 = vand.u32 2147483647, %v3365_v26 }
 0x325   : > { %v1587_v43 = vand.u32 2147483647, %v2725_v41  ;;  %v1543_v44 = vpop.f32.mrb[27].mxu0 }
 0x326   : > { %v1586_v45 = vand.u32 2147483647, %v1543_v44  ;;  %2748 = vmatprep.mubr.msk.f32.mxu1 %vm514_vm4, %v1677_v40 }
 0x327   : > { %2749 = vmatmul.mubr.msk.f32.vlgmr.msra.gmra.mrb[20].mxu1 %vm514_vm4, %v1678_v42  ;;  %v1680_v51 = vmul.f32 %v2406_v47, %v1587_v43 }
 0x328   : > { %v1679_v48 = vmul.f32 %v2405_v46, %v1586_v45  ;;  %v2728_v49 = vpop.f32.mrb[28].mxu0 }
 0x329   : > { %v1589_v52 = vand.u32 2147483647, %v2728_v49  ;;  %v1553_v53 = vpop.f32.mrb[29].mxu0 }
 0x32a   : > { %v1588_v55 = vand.u32 2147483647, %v1553_v53  ;;  %2751 = vmatprep.mubr.msk.f32.mxu1 %vm514_vm4, %v1679_v48 }
 0x32b   : > { %2752 = vmatmul.mubr.msk.f32.gmra.mrb[22].mxu1 %vm514_vm4, %v1680_v51  ;;  %v1682_v60 = vmul.f32 %v2408_v57, %v1589_v52 }
 0x32c   : > { %v1681_v58 = vmul.f32 %v2407_v56, %v1588_v55  ;;  %v2731_v59 = vpop.f32.mrb[30].mxu0 }
 0x32d   : > { %v1591_v61 = vand.u32 2147483647, %v2731_v59  ;;  %v1563_v62 = vpop.f32.mrb[31].mxu0 }
 0x32e   : > { %v1590_v63 = vand.u32 2147483647, %v1563_v62  ;;  %2754 = vmatprep.mubr.msk.f32.mxu1 %vm514_vm4, %v1681_v58  ;;  %v393_v62 = vld [vmem:[%s3494_s0 + $0x180] sm:$0xff] }
 0x32f   : > { %2755 = vmatmul.mubr.msk.f32.gmra.mrb[24].mxu1 %vm514_vm4, %v1682_v60  ;;  %v1684_v3 = vmul.f32 %v2410_v1, %v1591_v61 }
 0x330   : > { %v1683_v2 = vmul.f32 %v2409_v0, %v1590_v63  ;;  %v395_v63 = vld [vmem:[%s3494_s0 + $0x190] sm:$0xff]  ;;  %v398_v0 = vld [vmem:[%s3494_s0 + $0x1a8] sm:$0xff] }
 0x332   : > { %2757 = vmatprep.mubr.msk.f32.mxu1 %vm514_vm4, %v1683_v2 }
 0x333   : > { %2758 = vmatmul.mubr.msk.f32.gmra.mrb[26].mxu1 %vm514_vm4, %v1684_v3 }
 0x334   : > { %2776 = vmatprep.mubr.msk.f32.mxu1 %vm514_vm4, %v388_v4 }
 0x3fa   : > { %v2750_v5 = vpop.f32.mrb[20].mxu1 }
 0x3fb   : > { %v1775_v6 = vpop.f32.mrb[21].mxu1 }
 0x3fc   : > { %v2890_v7 = vpack.c.bf16 %v2750_v5, %v1775_v6 }
 0x3fe   : > { %v2753_v8 = vpop.f32.mrb[22].mxu1  ;;  %2891 = vmatprep.subr.bf16.mxu1 %v2890_v7 }
 0x3ff   : > { %v1785_v10 = vpop.f32.mrb[23].mxu1  ;;  %2893 = vmatpush3.bf16.msra.mxu1 %v2890_v7 }
 0x400   : > { %v2894_v11 = vpack.c.bf16 %v2753_v8, %v1785_v10 }
 0x402   : > { %v2756_v21 = vpop.f32.mrb[24].mxu1  ;;  %2895 = vmatprep.subr.bf16.mxu1 %v2894_v11 }
 0x403   : > { %v1795_v12 = vpop.f32.mrb[25].mxu1  ;;  %2897 = vmatpush3.bf16.msra.mxu1 %v2894_v11 }
 0x404   : > { %v2898_v13 = vpack.c.bf16 %v2756_v21, %v1795_v12  ;;  %v397_v12 = vld [vmem:[%s3494_s0 + $0x1a0] sm:$0xff] }
 0x406   : > { %v2759_v14 = vpop.f32.mrb[26].mxu1  ;;  %2899 = vmatprep.subr.bf16.mxu1 %v2898_v13 }
 0x407   : > { %v1805_v15 = vpop.f32.mrb[27].mxu1  ;;  %2901 = vmatpush3.bf16.msra.mxu1 %v2898_v13  ;;  %v399_v13 = vld [vmem:[%s3494_s0 + $0x1b0] sm:$0xff] }
 0x408   : > { %v2902_v16 = vpack.c.bf16 %v2759_v14, %v1805_v15 }
 0x40a   : > { %2903 = vmatprep.subr.bf16.mxu1 %v2902_v16 }
 0x40b   : > { %2905 = vmatpush3.bf16.msra.mxu1 %v2902_v16 }
 0x40e   : > { %2777 = vmatmul.mubr.msk.f32.vlgmr.msra.gmra.mrb[28].mxu1 %vm514_vm4, %v389_v17 }
 0x40f   : > { %2779 = vmatprep.mubr.msk.f32.mxu1 %vm514_vm4, %v390_v18 }
 0x412   : > { %2780 = vmatmul.mubr.msk.f32.gmra.mrb[30].mxu1 %vm514_vm4, %v391_v19  ;;  %vm1984_vm4 = vcmask 261120  }
 0x413   : > { %2790 = vmatprep.mubr.msk.f32.mxu1 %vm1984_vm4, %v392_v38  ;;  %2804 = vmatprep.mubr.msk.f32.mxu0 %vm1984_vm4, %v396_v24 }
 0x4e1   : > { %v2778_v22 = vpop.f32.mrb[28].mxu1 }
 0x4e2   : > { %1937 = vrot.lane.b32.xlu0 %v2778_v22, %s2962_s30  ;;  %v1892_v27 = vpop.f32.mrb[29].mxu1 }
 0x4e3   : > { %1935 = vrot.lane.b32.xlu1 %v1892_v27, %s2962_s30 }
 0x4e5   : > { %v2781_v28 = vpop.f32.mrb[30].mxu1 }
 0x4e6   : > { %1941 = vrot.lane.b32.xlu0 %v2781_v28, %s2962_s30  ;;  %v1902_v29 = vpop.f32.mrb[31].mxu1 }
 0x4e7   : > { %1939 = vrot.lane.b32.xlu1 %v1902_v29, %s2962_s30 }
 0x4ea   : > { %1608 = vperm.xlu0 %2948, %v1593_v30  }
 0x4eb   : > { %1605 = vperm.xlu1 %2949, %v1592_v31  }
 0x4ee   : > { %1614 = vperm.xlu0 %2948, %v1595_v32  }
 0x4ef   : > { %1611 = vperm.xlu1 %2949, %v1594_v33  }
 0x4f2   : > { %1917 = vrot.lane.b32.xlu0 %v1573_v34, %s2962_s30 }
 0x4f3   : > { %1915 = vrot.lane.b32.xlu1 %v1572_v35, %s2962_s30 }
 0x4f6   : > { %1921 = vrot.lane.b32.xlu0 %v1575_v36, %s2962_s30 }
 0x4f7   : > { %1919 = vrot.lane.b32.xlu1 %v1574_v37, %s2962_s30 }
 0x554   : > { %v1938_v23 = vpop.permute.xlu0 %1937 }
 0x555   : > { %v1948_v39 = vadd.f32 %v1938_v23, %v1573_v34  ;;  %v1936_v25 = vpop.permute.xlu1 %1935 }
 0x556   : > { %v1947_v26 = vadd.f32 %v1936_v25, %v1572_v35 }
 0x557   : > { %1957 = vrot.lane.b32.xlu0 %v1948_v39, %s2962_s30 }
 0x558   : > { %v1942_v40 = vpop.permute.xlu0 %1941  ;;  %1955 = vrot.lane.b32.xlu1 %v1947_v26, %s2962_s30 }
 0x559   : > { %v1950_v41 = vadd.f32 %v1942_v40, %v1575_v36  ;;  %v1940_v42 = vpop.permute.xlu1 %1939 }
 0x55a   : > { %v1949_v43 = vadd.f32 %v1940_v42, %v1574_v37 }
 0x55b   : > { %1961 = vrot.lane.b32.xlu0 %v1950_v41, %s2962_s30 }
 0x55c   : > { %1959 = vrot.lane.b32.xlu1 %v1949_v43, %s2962_s30 }
 0x569   : > { %v1609_v44 = vpop.permute.xlu0 %1608 }
 0x56a   : > { %v1606_v45 = vpop.permute.xlu1 %1605  ;;  %vm1617_vm10 = vcmp.eq.s32.totalorder %v3026_v9, %v1609_v44 }
 0x56b   : > { %vm1616_vm11 = vcmp.eq.s32.totalorder %v3026_v9, %v1606_v45  ;;  %v2400_v48 = vsel %vm1617_vm10, 1.0, %v2959_v20 }
 0x56c   : > { %v2399_v51 = vsel %vm1616_vm11, 1.0, %v2959_v20 }
 0x56d   : > { %v1615_v46 = vpop.permute.xlu0 %1614 }
 0x56e   : > { %v1612_v47 = vpop.permute.xlu1 %1611  ;;  %vm1619_vm12 = vcmp.eq.s32.totalorder %v3026_v9, %v1615_v46 }
 0x56f   : > { %vm1618_vm13 = vcmp.eq.s32.totalorder %v3026_v9, %v1612_v47  ;;  %v2402_v55 = vsel %vm1619_vm12, 1.0, %v2959_v20  ;;  %v394_v9 = vld [vmem:[%s3494_s0 + $0x188] sm:$0xff] }
 0x570   : > { %v2401_v58 = vsel %vm1618_vm13, 1.0, %v2959_v20 }
 0x571   : > { %v1918_v49 = vpop.permute.xlu0 %1917 }
 0x572   : > { %v1928_v50 = vmul.f32 %v2400_v48, %v1918_v49  ;;  %v1916_v52 = vpop.permute.xlu1 %1915 }
 0x573   : > { %v1927_v53 = vmul.f32 %v2399_v51, %v1916_v52 }
 0x574   : > { %v1975_v1 = vsel %vm1971_vm14, %v1928_v50, 0.0 }
 0x575   : > { %v2906_v54 = vpack.c.bf16 %v1928_v50, %v1927_v53  ;;  %v1922_v56 = vpop.permute.xlu0 %1921  ;;  %v1972_v20 = vsel %vm1971_vm14, %v1927_v53, 0.0 }
 0x576   : > { %v1930_v57 = vmul.f32 %v2402_v55, %v1922_v56  ;;  %v1920_v59 = vpop.permute.xlu1 %1919 }
 0x577   : > { %v1929_v60 = vmul.f32 %v2401_v58, %v1920_v59  ;;  %2907 = vmatprep.subr.bf16.mxu1 %v2906_v54 }
 0x578   : > { %2909 = vmatpush3.bf16.msra.mxu1 %v2906_v54  ;;  %v1981_v29 = vsel %vm1971_vm14, %v1930_v57, 0.0 }
 0x579   : > { %v2910_v61 = vpack.c.bf16 %v1930_v57, %v1929_v60  ;;  %v1978_v30 = vsel %vm1971_vm14, %v1929_v60, 0.0 }
 0x57b   : > { %2911 = vmatprep.subr.bf16.mxu1 %v2910_v61 }
 0x57c   : > { %2913 = vmatpush3.bf16.msra.mxu1 %v2910_v61 }
 0x57f   : > { %2791 = vmatmul.mubr.msk.f32.vlgmr.msra.gmra.mrb[32].mxu1 %vm1984_vm4, %v393_v62 }
 0x580   : > { %1973 = vadd.xlane.f32.xlu1 %v1972_v20  ;;  %2793 = vmatprep.mubr.msk.f32.mxu1 %vm1984_vm4, %v394_v9 }
 0x583   : > { %2794 = vmatmul.mubr.msk.f32.gmra.mrb[34].mxu1 %vm1984_vm4, %v395_v63 }
 0x584   : > { %1976 = vadd.xlane.f32.xlu1 %v1975_v1  ;;  %2807 = vmatprep.mubr.msk.f32.mxu1 %vm1984_vm4, %v398_v0 }
 0x5c9   : > { %v1958_v2 = vpop.permute.xlu0 %1957 }
 0x5ca   : > { %v1968_v3 = vmul.f32 %v2400_v48, %v1958_v2  ;;  %v1956_v4 = vpop.permute.xlu1 %1955 }
 0x5cb   : > { %v1967_v5 = vmul.f32 %v2399_v51, %v1956_v4 }
 0x5cd   : > { %v2914_v6 = vpack.c.bf16 %v1968_v3, %v1967_v5  ;;  %v1962_v7 = vpop.permute.xlu0 %1961 }
 0x5ce   : > { %v1970_v8 = vmul.f32 %v2402_v55, %v1962_v7  ;;  %v1960_v10 = vpop.permute.xlu1 %1959 }
 0x5cf   : > { %v1969_v11 = vmul.f32 %v2401_v58, %v1960_v10  ;;  %2915 = vmatprep.subr.bf16.mxu0 %v2914_v6  ;;  %2922 = vmatprep.subr.bf16.mxu1 %v2914_v6 }
 0x5d0   : > { %2917 = vmatpush3.bf16.msra.mxu0 %v2914_v6  ;;  %2924 = vmatpush3.bf16.msra.mxu1 %v2914_v6 }
 0x5d1   : > { %v2918_v21 = vpack.c.bf16 %v1970_v8, %v1969_v11 }
 0x5d3   : > { %2919 = vmatprep.subr.bf16.mxu0 %v2918_v21  ;;  %2923 = vmatprep.subr.bf16.mxu1 %v2918_v21 }
 0x5d4   : > { %2921 = vmatpush3.bf16.msra.mxu0 %v2918_v21  ;;  %2925 = vmatpush3.bf16.msra.mxu1 %v2918_v21 }
 0x5d7   : > { %2805 = vmatmul.mubr.msk.f32.vlgmr.msra.gmra.mrb[32].mxu0 %vm1984_vm4, %v397_v12  ;;  %2808 = vmatmul.mubr.msk.f32.vlgmr.msra.gmra.mrb[36].mxu1 %vm1984_vm4, %v399_v13 }
 0x60d   : > { %v1974_v14 = vpop.xlane.xlu1 %1973 }
 0x60e   : > { %2203 = vst [vmem:[%s3467_s7] sm:$0xff] %v1974_v14 }
 0x611   : > { %v1977_v15 = vpop.xlane.xlu1 %1976 }
 0x612   : > { %2204 = vst [vmem:[%s3467_s7 + $0x18] sm:$0xff] %v1977_v15 }
 0x652   : > { %v2792_v16 = vpop.f32.mrb[32].mxu1 }
 0x653   : > { %v2063_v17 = vpop.f32.mrb[33].mxu1  ;;  %v2085_v22 = vsel %vm1971_vm14, %v2792_v16, 0.0 }
 0x654   : > { %v2082_v18 = vsel %vm1971_vm14, %v2063_v17, 0.0 }
 0x655   : > { %2083 = vadd.xlane.f32.xlu0 %v2082_v18 }
 0x656   : > { %v2795_v19 = vpop.f32.mrb[34].mxu1 }
 0x657   : > { %v2073_v27 = vpop.f32.mrb[35].mxu1  ;;  %v2091_v23 = vsel %vm1971_vm14, %v2795_v19, 0.0 }
 0x658   : > { %v2088_v28 = vsel %vm1971_vm14, %v2073_v27, 0.0 }
 0x659   : > { %2086 = vadd.xlane.f32.xlu0 %v2085_v22  ;;  %2089 = vadd.xlane.f32.xlu1 %v2088_v28 }
 0x65d   : > { %1982 = vadd.xlane.f32.xlu1 %v1981_v29  ;;  %1979 = vadd.xlane.f32.xlu0 %v1978_v30 }
 0x6aa   : > { %v2806_v31 = vpop.f32.mrb[32].mxu0  ;;  %v2809_v32 = vpop.f32.mrb[36].mxu1 }
 0x6ab   : > { %v2172_v33 = vpop.f32.mrb[33].mxu0  ;;  %v2182_v34 = vpop.f32.mrb[37].mxu1  ;;  %v2194_v35 = vsel %vm1971_vm14, %v2806_v31, 0.0  ;;  %v2200_v37 = vsel %vm1971_vm14, %v2809_v32, 0.0 }
 0x6ac   : > { %v2191_v36 = vsel %vm1971_vm14, %v2172_v33, 0.0  ;;  %2195 = vadd.xlane.f32.xlu1 %v2194_v35  ;;  %v2197_v38 = vsel %vm1971_vm14, %v2182_v34, 0.0 }
 0x6ad   : > { %2192 = vadd.xlane.f32.xlu0 %v2191_v36 }
 0x6b0   : > { %2201 = vadd.xlane.f32.xlu1 %v2200_v37 }
 0x6b1   : > { %2198 = vadd.xlane.f32.xlu0 %v2197_v38 }
 0x6b5   : > { %2092 = vadd.xlane.f32.xlu0 %v2091_v23 }
 0x6e2   : > { %v2084_v24 = vpop.xlane.xlu0 %2083 }
 0x6e3   : > { %2207 = vst [vmem:[%s3467_s7 + $0x8] sm:$0xff] %v2084_v24 }
 0x6e6   : > { %v2087_v39 = vpop.xlane.xlu0 %2086  ;;  %v2090_v25 = vpop.xlane.xlu1 %2089 }
 0x6e7   : > { %2208 = vst [vmem:[%s3467_s7 + $0x20] sm:$0xff] %v2087_v39  ;;  %2209 = vst [vmem:[%s3467_s7 + $0x38] sm:$0xff] %v2090_v25 }
 0x6ea   : > { %v1980_v26 = vpop.xlane.xlu0 %1979  ;;  %v1983_v40 = vpop.xlane.xlu1 %1982 }
 0x6eb   : > { %2205 = vst [vmem:[%s3467_s7 + $0x30] sm:$0xff] %v1980_v26  ;;  %2206 = vst [vmem:[%s3467_s7 + $0x48] sm:$0xff] %v1983_v40 }
 0x739   : > { %v2196_v41 = vpop.xlane.xlu1 %2195 }
 0x73a   : > { %v2193_v42 = vpop.xlane.xlu0 %2192  ;;  %2212 = vst [vmem:[%s3467_s7 + $0x28] sm:$0xff] %v2196_v41 }
 0x73b   : > { %2211 = vst [vmem:[%s3467_s7 + $0x10] sm:$0xff] %v2193_v42 }
 0x73d   : > { %v2202_v44 = vpop.xlane.xlu1 %2201 }
 0x73e   : > { %v2199_v43 = vpop.xlane.xlu0 %2198  ;;  %2214 = vst [vmem:[%s3467_s7 + $0x58] sm:$0xff] %v2202_v44 }
 0x73f   : > { %2213 = vst [vmem:[%s3467_s7 + $0x40] sm:$0xff] %v2199_v43 }
 0x742   : > { %v2093_v45 = vpop.xlane.xlu0 %2092 }
 0x743   : > { %2210 = vst [vmem:[%s3467_s7 + $0x50] sm:$0xff] %v2093_v45 }
 0x744 PF: > { %s16_s21 = sadd.s32 1, %s2956_s21  }
 0x745   : > { %p13_p5 = scmp.ge.s32.totalorder %s16_s21, 4  }
 0x747   :  { %15 = sbr.rel (!%p13_p5) target bundleno = 1 (0x1), region = 86 }

</bundles_post_ra>
